<compile_context>
chip_gen: v5e
topology: v5e:2x2
jax: 0.10.0
libtpu: 0.0.40
codegen_flags: <defaults>
</compile_context>

<pallas_src>
import functools

import jax
import jax.numpy as jnp
from jax.experimental import pallas as pl
from jax.experimental.pallas import tpu as pltpu


def sampling_generator(N, reverse=False):
    samplings = [False, True] * (N // 2)
    if reverse:
        return list(reversed(samplings[:N]))
    return samplings[:N]


# ----------------------------------------------------------------------------
# Pallas kernel: (folded im2col patches) @ W_blockdiag + b -> GroupNorm(2) -> SiLU
# One grid step == one sample (per-sample GroupNorm stays block-local).
# ----------------------------------------------------------------------------
def _convsc_kernel(p_ref, w_ref, sp_ref, o_ref, *, C, half, inv_n, eps):
    # p_ref  : (1, rows, FK) bf16 -- `fold` spatial positions per row
    # w_ref  : (FK, FC)      bf16 -- block-diagonal (fold x) conv weight
    # sp_ref : (8, FC)       f32  -- row 0 bias, row 1 gamma, row 2 beta
    # o_ref  : (1, rows, FC) f32  -- FC = fold*C (lane-dense, 128)
    sp = sp_ref[...]
    bias = sp[0:1, :]
    gamma = sp[1:2, :]
    beta = sp[2:3, :]

    y = jnp.dot(p_ref[0], w_ref[...],
                preferred_element_type=jnp.float32) + bias            # (rows, FC)

    # GroupNorm(2): lane c belongs to group 0 iff (c % C) < C//2.
    col = jax.lax.broadcasted_iota(jnp.int32, (1, y.shape[-1]), 1)
    g0 = (col % C) < half                                             # (1, FC)

    # Sublane reduce first (full 128-lane width), then tiny masked lane reduce.
    colsum = jnp.sum(y, axis=0, keepdims=True)                        # (1, FC)
    s0 = jnp.sum(jnp.where(g0, colsum, 0.0), axis=1, keepdims=True)   # (1, 1)
    s1 = jnp.sum(colsum, axis=1, keepdims=True) - s0
    mean = jnp.where(g0, s0 * inv_n, s1 * inv_n)                      # (1, FC)

    yc = y - mean
    csq = jnp.sum(yc * yc, axis=0, keepdims=True)                     # (1, FC)
    q0 = jnp.sum(jnp.where(g0, csq, 0.0), axis=1, keepdims=True)
    q1 = jnp.sum(csq, axis=1, keepdims=True) - q0
    rstd = jnp.where(g0,
                     jax.lax.rsqrt(q0 * inv_n + eps),                 # EUP
                     jax.lax.rsqrt(q1 * inv_n + eps))                 # (1, FC)

    yn = yc * (rstd * gamma) + beta
    o_ref[0] = yn * jax.nn.sigmoid(yn)                                # SiLU


def _convsc_pallas(patches_f, w2, scalar_params, *, C, L):
    B, rows, FK = patches_f.shape
    FC = w2.shape[1]
    half = C // 2
    inv_n = 1.0 / float(L * half)

    kernel = functools.partial(_convsc_kernel, C=C, half=half,
                               inv_n=inv_n, eps=1e-5)
    cost = pl.CostEstimate(
        flops=2 * B * rows * FK * FC,
        transcendentals=B * rows * FC + 4 * B,
        bytes_accessed=(patches_f.size * 2 + w2.size * 2
                        + scalar_params.size * 4 + B * rows * FC * 4),
    )
    return pl.pallas_call(
        kernel,
        out_shape=jax.ShapeDtypeStruct((B, rows, FC), jnp.float32),
        grid_spec=pltpu.PrefetchScalarGridSpec(
            num_scalar_prefetch=0,
            grid=(B,),  # one sample per step; weight / scalar-param block
                        # indices are constant across steps -> DMA'd once.
            in_specs=[
                pl.BlockSpec((1, rows, FK), lambda b: (b, 0, 0)),
                pl.BlockSpec((FK, FC), lambda b: (0, 0)),
                pl.BlockSpec((8, FC), lambda b: (0, 0)),
            ],
            out_specs=pl.BlockSpec((1, rows, FC), lambda b: (b, 0, 0)),
        ),
        compiler_params=pltpu.CompilerParams(
            dimension_semantics=("parallel",)),  # v7x: one sample per TC
        cost_estimate=cost,
    )(patches_f, w2, scalar_params)


# ----------------------------------------------------------------------------
# Glue: im2col (pad + strided slices + reshape) in plain JAX; XLA fuses it.
# ----------------------------------------------------------------------------
def _im2col(x_nhwc, k, stride):
    B, H, W, C = x_nhwc.shape
    pad = (k - stride + 1) // 2
    xp = jnp.pad(x_nhwc, ((0, 0), (pad, pad), (pad, pad), (0, 0)))
    H_out = (H + 2 * pad - k) // stride + 1
    W_out = (W + 2 * pad - k) // stride + 1
    cols = []
    for dh in range(k):
        for dw in range(k):
            sl = jax.lax.slice(
                xp,
                (0, dh, dw, 0),
                (B, dh + stride * (H_out - 1) + 1,
                 dw + stride * (W_out - 1) + 1, C),
                (1, stride, stride, 1))            # (B, H_out, W_out, C)
            cols.append(sl)
    patches = jnp.concatenate(cols, axis=-1)       # tap order (dh, dw, c)
    return patches.reshape(B, H_out * W_out, k * k * C), H_out, W_out


def _convsc_stage(x_nhwc, params, k, stride):
    """One COTEREConvSC stage (conv -> GroupNorm(2) -> SiLU). NHWC in/out."""
    B = x_nhwc.shape[0]
    C_out = params["w"].shape[1]

    # TODO(synk): for large H*W, fuse im2col into the kernel (tap loop over
    # shifted VMEM views) and tile L with an explicit vmem_limit_bytes; at the
    # shapes used here the patch tensor is tiny and overhead-dominated.
    patches, H_out, W_out = _im2col(x_nhwc, k, stride)   # (B, L, K) f32
    L = H_out * W_out
    K = patches.shape[-1]

    # Pack `fold` spatial positions per row so the kernel last dim is 128.
    if C_out <= 128 and 128 % C_out == 0 and L % (128 // C_out) == 0:
        fold = 128 // C_out
    else:
        fold = 1  # correct fallback (masked stores) for awkward channel counts
    lane_quant = max(8, 128 // fold)          # makes fold*Kp a multiple of 128
    Kp = ((K + lane_quant - 1) // lane_quant) * lane_quant
    FC = fold * C_out

    patches = jnp.pad(patches, ((0, 0), (0, 0), (0, Kp - K)))
    patches_f = patches.reshape(B, L // fold, fold * Kp).astype(jnp.bfloat16)

    # Block-diagonal weight: row-major fold of the output falls out of one
    # MXU matmul, no in-kernel reshape needed.  Weight flattening order
    # (kh, kw, C_in) matches the im2col tap order above.
    w_pad = jnp.pad(params["w"], ((0, Kp - K), (0, 0)))              # (Kp, C)
    w2 = jnp.kron(jnp.eye(fold, dtype=w_pad.dtype), w_pad).astype(jnp.bfloat16)

    # Single (8, FC) f32 slab for bias / gamma / beta -> one DMA per call.
    scalar_params = jnp.concatenate(
        [jnp.tile(params["b"], (1, fold)),
         jnp.tile(params["gamma"], (1, fold)),
         jnp.tile(params["beta"], (1, fold)),
         jnp.zeros((5, FC), jnp.float32)], axis=0)                   # (8, FC)

    out = _convsc_pallas(patches_f, w2, scalar_params,
                         C=C_out, L=L)                  # (B, L//fold, fold*C)
    return out.reshape(B, H_out, W_out, C_out)          # pure row-major reshape


# ----------------------------------------------------------------------------
# Encoder
# ----------------------------------------------------------------------------
def init_encoder_params(key, C_in, C_hid, N_S, spatio_kernel):
    samplings = sampling_generator(N_S)
    params = []
    c_prev = C_in
    for _s in samplings:
        key, k_w = jax.random.split(key)
        fan_in = spatio_kernel * spatio_kernel * c_prev
        w = (jax.random.normal(k_w, (spatio_kernel, spatio_kernel, c_prev, C_hid),
                               dtype=jnp.float32) / jnp.sqrt(float(fan_in)))
        params.append({
            "w": w.reshape(spatio_kernel * spatio_kernel * c_prev, C_hid),
            "b": jnp.zeros((1, C_hid), jnp.float32),
            "gamma": jnp.ones((1, C_hid), jnp.float32),
            "beta": jnp.zeros((1, C_hid), jnp.float32),
        })
        c_prev = C_hid
    return params


@functools.partial(jax.jit, static_argnames=("spatio_kernel",))
def encoder_forward(x_nchw, params, spatio_kernel):
    """Matches Encoder.forward: returns (latent, enc1), both NCHW."""
    # Strides are static Python ints derived from the (static) stage count.
    samplings = sampling_generator(len(params))
    strides = [2 if s else 1 for s in samplings]

    x = jnp.transpose(x_nchw, (0, 2, 3, 1))              # NCHW -> NHWC
    enc1 = _convsc_stage(x, params[0], spatio_kernel, strides[0])
    latent = enc1
    for i in range(1, len(params)):
        latent = _convsc_stage(latent, params[i], spatio_kernel, strides[i])
    return (jnp.transpose(latent, (0, 3, 1, 2)),
            jnp.transpose(enc1, (0, 3, 1, 2)))


if __name__ == "__main__":
    # Small shapes consistent with the module: B=2, C_in=4, H=W=16,
    # C_hid=32, N_S=2 (stage 0: stride 1, stage 1: stride 2 downsampling).
    B, C_in, H, W = 2, 4, 16, 16
    C_hid, N_S, spatio_kernel = 32, 2, 3

    key = jax.random.PRNGKey(0)
    key, k_x = jax.random.split(key)
    x = jax.random.normal(k_x, (B, C_in, H, W), dtype=jnp.float32)

    params = init_encoder_params(key, C_in, C_hid, N_S, spatio_kernel)

    latent, enc1 = encoder_forward(x, params, spatio_kernel)
    jax.block_until_ready((latent, enc1))

    assert enc1.shape == (B, C_hid, H, W), enc1.shape
    assert latent.shape == (B, C_hid, H // 2, W // 2), latent.shape
    assert bool(jnp.all(jnp.isfinite(latent))) and bool(jnp.all(jnp.isfinite(enc1)))
    print("KERNEL_OK")
</pallas_src>

<mosaic_0001>
module attributes {stable_mosaic.version = 11 : i64} {
  func.func @_convsc_kernel(%arg0: i32, %arg1: memref<1x64x256xbf16, #tpu.memory_space<vmem>>, %arg2: memref<256x128xbf16, #tpu.memory_space<vmem>>, %arg3: memref<8x128xf32, #tpu.memory_space<vmem>>, %arg4: memref<1x64x128xf32, #tpu.memory_space<vmem>>) attributes {dimension_semantics = [#tpu.dimension_semantics<parallel>], iteration_bounds = array<i64: 2>, scalar_prefetch = 0 : i64, scratch_operands = 0 : i64, tpu.core_type = #tpu.core_type<tc>, window_params = [{transform_indices = @transform_0, window_bounds = array<i64: 1, 64, 256>}, {pipeline_mode = #tpu.pipeline_mode<synchronous>, transform_indices = @transform_1, window_bounds = array<i64: 256, 128>}, {pipeline_mode = #tpu.pipeline_mode<synchronous>, transform_indices = @transform_2, window_bounds = array<i64: 8, 128>}, {transform_indices = @transform_3, window_bounds = array<i64: 1, 64, 128>}]} {
    %c0 = arith.constant 0 : index
    %c0_0 = arith.constant 0 : index
    %0 = vector.load %arg3[%c0, %c0_0] : memref<8x128xf32, #tpu.memory_space<vmem>>, vector<8x128xf32>
    %1 = vector.extract_strided_slice %0 {offsets = [0, 0], sizes = [1, 128], strides = [1, 1]} : vector<8x128xf32> to vector<1x128xf32>
    %2 = vector.extract_strided_slice %0 {offsets = [1, 0], sizes = [1, 128], strides = [1, 1]} : vector<8x128xf32> to vector<1x128xf32>
    %3 = vector.extract_strided_slice %0 {offsets = [2, 0], sizes = [1, 128], strides = [1, 1]} : vector<8x128xf32> to vector<1x128xf32>
    %c0_1 = arith.constant 0 : index
    %c0_2 = arith.constant 0 : index
    %c0_3 = arith.constant 0 : index
    %4 = vector.load %arg1[%c0_1, %c0_2, %c0_3] : memref<1x64x256xbf16, #tpu.memory_space<vmem>>, vector<1x64x256xbf16>
    %5 = vector.shape_cast %4 : vector<1x64x256xbf16> to vector<64x256xbf16>
    %c0_4 = arith.constant 0 : index
    %c0_5 = arith.constant 0 : index
    %6 = vector.load %arg2[%c0_4, %c0_5] : memref<256x128xbf16, #tpu.memory_space<vmem>>, vector<256x128xbf16>
    %cst = arith.constant dense<0.000000e+00> : vector<64x128xf32>
    %7 = tpu.matmul %5, %6, %cst {dimension_numbers = #tpu.dot_dimension_numbers<[1], [0], [0], [1], [0, 0, 1, 1], [], []>} : vector<64x256xbf16>, vector<256x128xbf16>, vector<64x128xf32> -> vector<64x128xf32>
    %8 = vector.broadcast %1 : vector<1x128xf32> to vector<64x128xf32>
    %9 = arith.addf %7, %8 : vector<64x128xf32>
    %10 = tpu.iota {dimensions = array<i32: 1>} : vector<1x128xi32>
    %c32_i32 = arith.constant 32 : i32
    %c0_i32 = arith.constant 0 : i32
    %11 = arith.cmpi eq, %c32_i32, %c0_i32 : i32
    %c1_i32 = arith.constant 1 : i32
    %12 = arith.select %11, %c1_i32, %c32_i32 : i32
    %13 = vector.broadcast %12 : i32 to vector<1x128xi32>
    %14 = arith.remsi %10, %13 : vector<1x128xi32>
    %c0_i32_6 = arith.constant 0 : i32
    %15 = vector.broadcast %c0_i32_6 : i32 to vector<1x128xi32>
    %16 = arith.cmpi ne, %14, %15 : vector<1x128xi32>
    %c0_i32_7 = arith.constant 0 : i32
    %17 = vector.broadcast %c0_i32_7 : i32 to vector<1x128xi32>
    %18 = arith.cmpi slt, %14, %17 : vector<1x128xi32>
    %c0_i32_8 = arith.constant 0 : i32
    %19 = arith.cmpi slt, %12, %c0_i32_8 : i32
    %20 = vector.broadcast %19 : i1 to vector<1x128xi1>
    %21 = vector.broadcast %20 : vector<1x128xi1> to vector<1x128xi1>
    %22 = arith.xori %18, %21 : vector<1x128xi1>
    %23 = arith.andi %22, %16 : vector<1x128xi1>
    %24 = vector.broadcast %12 : i32 to vector<1x128xi32>
    %25 = arith.addi %14, %24 : vector<1x128xi32>
    %26 = arith.select %23, %25, %14 : vector<1x128xi1>, vector<1x128xi32>
    %c16_i32 = arith.constant 16 : i32
    %27 = vector.broadcast %c16_i32 : i32 to vector<1x128xi32>
    %28 = arith.cmpi slt, %26, %27 : vector<1x128xi32>
    %cst_9 = arith.constant dense<0.000000e+00> : vector<128xf32>
    %29 = vector.multi_reduction <add>, %9, %cst_9 [0] : vector<64x128xf32> to vector<128xf32>
    %30 = vector.shape_cast %29 : vector<128xf32> to vector<1x128xf32>
    %cst_10 = arith.constant 0.000000e+00 : f32
    %31 = vector.broadcast %cst_10 : f32 to vector<1x128xf32>
    %32 = arith.select %28, %30, %31 : vector<1x128xi1>, vector<1x128xf32>
    %cst_11 = arith.constant dense<0.000000e+00> : vector<1xf32>
    %33 = vector.multi_reduction <add>, %32, %cst_11 [1] : vector<1x128xf32> to vector<1xf32>
    %34 = vector.shape_cast %33 : vector<1xf32> to vector<1x1xf32>
    %cst_12 = arith.constant dense<0.000000e+00> : vector<1xf32>
    %35 = vector.multi_reduction <add>, %30, %cst_12 [1] : vector<1x128xf32> to vector<1xf32>
    %36 = vector.shape_cast %35 : vector<1xf32> to vector<1x1xf32>
    %37 = arith.subf %36, %34 : vector<1x1xf32>
    %cst_13 = arith.constant 2.44140625E-4 : f32
    %38 = vector.broadcast %cst_13 : f32 to vector<1x1xf32>
    %39 = arith.mulf %34, %38 : vector<1x1xf32>
    %cst_14 = arith.constant 2.44140625E-4 : f32
    %40 = vector.broadcast %cst_14 : f32 to vector<1x1xf32>
    %41 = arith.mulf %37, %40 : vector<1x1xf32>
    %42 = vector.shape_cast %39 : vector<1x1xf32> to vector<1x1xf32>
    %43 = vector.broadcast %42 : vector<1x1xf32> to vector<1x128xf32>
    %44 = vector.shape_cast %41 : vector<1x1xf32> to vector<1x1xf32>
    %45 = vector.broadcast %44 : vector<1x1xf32> to vector<1x128xf32>
    %46 = arith.select %28, %43, %45 : vector<1x128xi1>, vector<1x128xf32>
    %47 = vector.broadcast %46 : vector<1x128xf32> to vector<64x128xf32>
    %48 = arith.subf %9, %47 : vector<64x128xf32>
    %49 = arith.mulf %48, %48 : vector<64x128xf32>
    %cst_15 = arith.constant dense<0.000000e+00> : vector<128xf32>
    %50 = vector.multi_reduction <add>, %49, %cst_15 [0] : vector<64x128xf32> to vector<128xf32>
    %51 = vector.shape_cast %50 : vector<128xf32> to vector<1x128xf32>
    %cst_16 = arith.constant 0.000000e+00 : f32
    %52 = vector.broadcast %cst_16 : f32 to vector<1x128xf32>
    %53 = arith.select %28, %51, %52 : vector<1x128xi1>, vector<1x128xf32>
    %cst_17 = arith.constant dense<0.000000e+00> : vector<1xf32>
    %54 = vector.multi_reduction <add>, %53, %cst_17 [1] : vector<1x128xf32> to vector<1xf32>
    %55 = vector.shape_cast %54 : vector<1xf32> to vector<1x1xf32>
    %cst_18 = arith.constant dense<0.000000e+00> : vector<1xf32>
    %56 = vector.multi_reduction <add>, %51, %cst_18 [1] : vector<1x128xf32> to vector<1xf32>
    %57 = vector.shape_cast %56 : vector<1xf32> to vector<1x1xf32>
    %58 = arith.subf %57, %55 : vector<1x1xf32>
    %cst_19 = arith.constant 2.44140625E-4 : f32
    %59 = vector.broadcast %cst_19 : f32 to vector<1x1xf32>
    %60 = arith.mulf %55, %59 : vector<1x1xf32>
    %cst_20 = arith.constant 9.99999974E-6 : f32
    %61 = vector.broadcast %cst_20 : f32 to vector<1x1xf32>
    %62 = arith.addf %60, %61 : vector<1x1xf32>
    %63 = math.rsqrt %62 : vector<1x1xf32>
    %cst_21 = arith.constant 2.44140625E-4 : f32
    %64 = vector.broadcast %cst_21 : f32 to vector<1x1xf32>
    %65 = arith.mulf %58, %64 : vector<1x1xf32>
    %cst_22 = arith.constant 9.99999974E-6 : f32
    %66 = vector.broadcast %cst_22 : f32 to vector<1x1xf32>
    %67 = arith.addf %65, %66 : vector<1x1xf32>
    %68 = math.rsqrt %67 : vector<1x1xf32>
    %69 = vector.shape_cast %63 : vector<1x1xf32> to vector<1x1xf32>
    %70 = vector.broadcast %69 : vector<1x1xf32> to vector<1x128xf32>
    %71 = vector.shape_cast %68 : vector<1x1xf32> to vector<1x1xf32>
    %72 = vector.broadcast %71 : vector<1x1xf32> to vector<1x128xf32>
    %73 = arith.select %28, %70, %72 : vector<1x128xi1>, vector<1x128xf32>
    %74 = arith.mulf %73, %2 : vector<1x128xf32>
    %75 = vector.broadcast %74 : vector<1x128xf32> to vector<64x128xf32>
    %76 = arith.mulf %48, %75 : vector<64x128xf32>
    %77 = vector.broadcast %3 : vector<1x128xf32> to vector<64x128xf32>
    %78 = arith.addf %76, %77 : vector<64x128xf32>
    %79 = arith.negf %78 : vector<64x128xf32>
    %80 = math.exp %79 : vector<64x128xf32>
    %cst_23 = arith.constant 1.000000e+00 : f32
    %81 = vector.broadcast %cst_23 : f32 to vector<64x128xf32>
    %82 = arith.addf %81, %80 : vector<64x128xf32>
    %83 = arith.divf %81, %82 : vector<64x128xf32>
    %84 = arith.mulf %78, %83 : vector<64x128xf32>
    %c0_24 = arith.constant 0 : index
    %c0_25 = arith.constant 0 : index
    %c0_26 = arith.constant 0 : index
    %85 = vector.load %arg4[%c0_24, %c0_25, %c0_26] : memref<1x64x128xf32, #tpu.memory_space<vmem>>, vector<1x64x128xf32>
    %86 = vector.shape_cast %85 : vector<1x64x128xf32> to vector<64x128xf32>
    %87 = vector.shape_cast %84 : vector<64x128xf32> to vector<1x64x128xf32>
    tpu.vector_store %arg4[%c0_24, %c0_25, %c0_26], %87 {strides = array<i32>} : memref<1x64x128xf32, #tpu.memory_space<vmem>>, vector<1x64x128xf32>,
    return
  }
  func.func @transform_0(%arg0: i32) -> (i32, i32, i32) {
    %c0_i32 = arith.constant 0 : i32
    %c0_i32_0 = arith.constant 0 : i32
    %c0_i32_1 = arith.constant 0 : i32
    return %arg0, %c0_i32, %c0_i32_0 : i32, i32, i32
  }
  func.func @transform_1(%arg0: i32) -> (i32, i32) {
    %c0_i32 = arith.constant 0 : i32
    %c0_i32_0 = arith.constant 0 : i32
    %c0_i32_1 = arith.constant 0 : i32
    return %c0_i32, %c0_i32_0 : i32, i32
  }
  func.func @transform_2(%arg0: i32) -> (i32, i32) {
    %c0_i32 = arith.constant 0 : i32
    %c0_i32_0 = arith.constant 0 : i32
    %c0_i32_1 = arith.constant 0 : i32
    return %c0_i32, %c0_i32_0 : i32, i32
  }
  func.func @transform_3(%arg0: i32) -> (i32, i32, i32) {
    %c0_i32 = arith.constant 0 : i32
    %c0_i32_0 = arith.constant 0 : i32
    %c0_i32_1 = arith.constant 0 : i32
    return %arg0, %c0_i32, %c0_i32_0 : i32, i32, i32
  }
}

module attributes {stable_mosaic.version = 11 : i64} {
  func.func @_convsc_kernel(%arg0: i32, %arg1: memref<1x16x1152xbf16, #tpu.memory_space<vmem>>, %arg2: memref<1152x128xbf16, #tpu.memory_space<vmem>>, %arg3: memref<8x128xf32, #tpu.memory_space<vmem>>, %arg4: memref<1x16x128xf32, #tpu.memory_space<vmem>>) attributes {dimension_semantics = [#tpu.dimension_semantics<parallel>], iteration_bounds = array<i64: 2>, scalar_prefetch = 0 : i64, scratch_operands = 0 : i64, tpu.core_type = #tpu.core_type<tc>, window_params = [{transform_indices = @transform_0, window_bounds = array<i64: 1, 16, 1152>}, {pipeline_mode = #tpu.pipeline_mode<synchronous>, transform_indices = @transform_1, window_bounds = array<i64: 1152, 128>}, {pipeline_mode = #tpu.pipeline_mode<synchronous>, transform_indices = @transform_2, window_bounds = array<i64: 8, 128>}, {transform_indices = @transform_3, window_bounds = array<i64: 1, 16, 128>}]} {
    %c0 = arith.constant 0 : index
    %c0_0 = arith.constant 0 : index
    %0 = vector.load %arg3[%c0, %c0_0] : memref<8x128xf32, #tpu.memory_space<vmem>>, vector<8x128xf32>
    %1 = vector.extract_strided_slice %0 {offsets = [0, 0], sizes = [1, 128], strides = [1, 1]} : vector<8x128xf32> to vector<1x128xf32>
    %2 = vector.extract_strided_slice %0 {offsets = [1, 0], sizes = [1, 128], strides = [1, 1]} : vector<8x128xf32> to vector<1x128xf32>
    %3 = vector.extract_strided_slice %0 {offsets = [2, 0], sizes = [1, 128], strides = [1, 1]} : vector<8x128xf32> to vector<1x128xf32>
    %c0_1 = arith.constant 0 : index
    %c0_2 = arith.constant 0 : index
    %c0_3 = arith.constant 0 : index
    %4 = vector.load %arg1[%c0_1, %c0_2, %c0_3] : memref<1x16x1152xbf16, #tpu.memory_space<vmem>>, vector<1x16x1152xbf16>
    %5 = vector.shape_cast %4 : vector<1x16x1152xbf16> to vector<16x1152xbf16>
    %c0_4 = arith.constant 0 : index
    %c0_5 = arith.constant 0 : index
    %6 = vector.load %arg2[%c0_4, %c0_5] : memref<1152x128xbf16, #tpu.memory_space<vmem>>, vector<1152x128xbf16>
    %cst = arith.constant dense<0.000000e+00> : vector<16x128xf32>
    %7 = tpu.matmul %5, %6, %cst {dimension_numbers = #tpu.dot_dimension_numbers<[1], [0], [0], [1], [0, 0, 1, 1], [], []>} : vector<16x1152xbf16>, vector<1152x128xbf16>, vector<16x128xf32> -> vector<16x128xf32>
    %8 = vector.broadcast %1 : vector<1x128xf32> to vector<16x128xf32>
    %9 = arith.addf %7, %8 : vector<16x128xf32>
    %10 = tpu.iota {dimensions = array<i32: 1>} : vector<1x128xi32>
    %c32_i32 = arith.constant 32 : i32
    %c0_i32 = arith.constant 0 : i32
    %11 = arith.cmpi eq, %c32_i32, %c0_i32 : i32
    %c1_i32 = arith.constant 1 : i32
    %12 = arith.select %11, %c1_i32, %c32_i32 : i32
    %13 = vector.broadcast %12 : i32 to vector<1x128xi32>
    %14 = arith.remsi %10, %13 : vector<1x128xi32>
    %c0_i32_6 = arith.constant 0 : i32
    %15 = vector.broadcast %c0_i32_6 : i32 to vector<1x128xi32>
    %16 = arith.cmpi ne, %14, %15 : vector<1x128xi32>
    %c0_i32_7 = arith.constant 0 : i32
    %17 = vector.broadcast %c0_i32_7 : i32 to vector<1x128xi32>
    %18 = arith.cmpi slt, %14, %17 : vector<1x128xi32>
    %c0_i32_8 = arith.constant 0 : i32
    %19 = arith.cmpi slt, %12, %c0_i32_8 : i32
    %20 = vector.broadcast %19 : i1 to vector<1x128xi1>
    %21 = vector.broadcast %20 : vector<1x128xi1> to vector<1x128xi1>
    %22 = arith.xori %18, %21 : vector<1x128xi1>
    %23 = arith.andi %22, %16 : vector<1x128xi1>
    %24 = vector.broadcast %12 : i32 to vector<1x128xi32>
    %25 = arith.addi %14, %24 : vector<1x128xi32>
    %26 = arith.select %23, %25, %14 : vector<1x128xi1>, vector<1x128xi32>
    %c16_i32 = arith.constant 16 : i32
    %27 = vector.broadcast %c16_i32 : i32 to vector<1x128xi32>
    %28 = arith.cmpi slt, %26, %27 : vector<1x128xi32>
    %cst_9 = arith.constant dense<0.000000e+00> : vector<128xf32>
    %29 = vector.multi_reduction <add>, %9, %cst_9 [0] : vector<16x128xf32> to vector<128xf32>
    %30 = vector.shape_cast %29 : vector<128xf32> to vector<1x128xf32>
    %cst_10 = arith.constant 0.000000e+00 : f32
    %31 = vector.broadcast %cst_10 : f32 to vector<1x128xf32>
    %32 = arith.select %28, %30, %31 : vector<1x128xi1>, vector<1x128xf32>
    %cst_11 = arith.constant dense<0.000000e+00> : vector<1xf32>
    %33 = vector.multi_reduction <add>, %32, %cst_11 [1] : vector<1x128xf32> to vector<1xf32>
    %34 = vector.shape_cast %33 : vector<1xf32> to vector<1x1xf32>
    %cst_12 = arith.constant dense<0.000000e+00> : vector<1xf32>
    %35 = vector.multi_reduction <add>, %30, %cst_12 [1] : vector<1x128xf32> to vector<1xf32>
    %36 = vector.shape_cast %35 : vector<1xf32> to vector<1x1xf32>
    %37 = arith.subf %36, %34 : vector<1x1xf32>
    %cst_13 = arith.constant 9.765625E-4 : f32
    %38 = vector.broadcast %cst_13 : f32 to vector<1x1xf32>
    %39 = arith.mulf %34, %38 : vector<1x1xf32>
    %cst_14 = arith.constant 9.765625E-4 : f32
    %40 = vector.broadcast %cst_14 : f32 to vector<1x1xf32>
    %41 = arith.mulf %37, %40 : vector<1x1xf32>
    %42 = vector.shape_cast %39 : vector<1x1xf32> to vector<1x1xf32>
    %43 = vector.broadcast %42 : vector<1x1xf32> to vector<1x128xf32>
    %44 = vector.shape_cast %41 : vector<1x1xf32> to vector<1x1xf32>
    %45 = vector.broadcast %44 : vector<1x1xf32> to vector<1x128xf32>
    %46 = arith.select %28, %43, %45 : vector<1x128xi1>, vector<1x128xf32>
    %47 = vector.broadcast %46 : vector<1x128xf32> to vector<16x128xf32>
    %48 = arith.subf %9, %47 : vector<16x128xf32>
    %49 = arith.mulf %48, %48 : vector<16x128xf32>
    %cst_15 = arith.constant dense<0.000000e+00> : vector<128xf32>
    %50 = vector.multi_reduction <add>, %49, %cst_15 [0] : vector<16x128xf32> to vector<128xf32>
    %51 = vector.shape_cast %50 : vector<128xf32> to vector<1x128xf32>
    %cst_16 = arith.constant 0.000000e+00 : f32
    %52 = vector.broadcast %cst_16 : f32 to vector<1x128xf32>
    %53 = arith.select %28, %51, %52 : vector<1x128xi1>, vector<1x128xf32>
    %cst_17 = arith.constant dense<0.000000e+00> : vector<1xf32>
    %54 = vector.multi_reduction <add>, %53, %cst_17 [1] : vector<1x128xf32> to vector<1xf32>
    %55 = vector.shape_cast %54 : vector<1xf32> to vector<1x1xf32>
    %cst_18 = arith.constant dense<0.000000e+00> : vector<1xf32>
    %56 = vector.multi_reduction <add>, %51, %cst_18 [1] : vector<1x128xf32> to vector<1xf32>
    %57 = vector.shape_cast %56 : vector<1xf32> to vector<1x1xf32>
    %58 = arith.subf %57, %55 : vector<1x1xf32>
    %cst_19 = arith.constant 9.765625E-4 : f32
    %59 = vector.broadcast %cst_19 : f32 to vector<1x1xf32>
    %60 = arith.mulf %55, %59 : vector<1x1xf32>
    %cst_20 = arith.constant 9.99999974E-6 : f32
    %61 = vector.broadcast %cst_20 : f32 to vector<1x1xf32>
    %62 = arith.addf %60, %61 : vector<1x1xf32>
    %63 = math.rsqrt %62 : vector<1x1xf32>
    %cst_21 = arith.constant 9.765625E-4 : f32
    %64 = vector.broadcast %cst_21 : f32 to vector<1x1xf32>
    %65 = arith.mulf %58, %64 : vector<1x1xf32>
    %cst_22 = arith.constant 9.99999974E-6 : f32
    %66 = vector.broadcast %cst_22 : f32 to vector<1x1xf32>
    %67 = arith.addf %65, %66 : vector<1x1xf32>
    %68 = math.rsqrt %67 : vector<1x1xf32>
    %69 = vector.shape_cast %63 : vector<1x1xf32> to vector<1x1xf32>
    %70 = vector.broadcast %69 : vector<1x1xf32> to vector<1x128xf32>
    %71 = vector.shape_cast %68 : vector<1x1xf32> to vector<1x1xf32>
    %72 = vector.broadcast %71 : vector<1x1xf32> to vector<1x128xf32>
    %73 = arith.select %28, %70, %72 : vector<1x128xi1>, vector<1x128xf32>
    %74 = arith.mulf %73, %2 : vector<1x128xf32>
    %75 = vector.broadcast %74 : vector<1x128xf32> to vector<16x128xf32>
    %76 = arith.mulf %48, %75 : vector<16x128xf32>
    %77 = vector.broadcast %3 : vector<1x128xf32> to vector<16x128xf32>
    %78 = arith.addf %76, %77 : vector<16x128xf32>
    %79 = arith.negf %78 : vector<16x128xf32>
    %80 = math.exp %79 : vector<16x128xf32>
    %cst_23 = arith.constant 1.000000e+00 : f32
    %81 = vector.broadcast %cst_23 : f32 to vector<16x128xf32>
    %82 = arith.addf %81, %80 : vector<16x128xf32>
    %83 = arith.divf %81, %82 : vector<16x128xf32>
    %84 = arith.mulf %78, %83 : vector<16x128xf32>
    %c0_24 = arith.constant 0 : index
    %c0_25 = arith.constant 0 : index
    %c0_26 = arith.constant 0 : index
    %85 = vector.load %arg4[%c0_24, %c0_25, %c0_26] : memref<1x16x128xf32, #tpu.memory_space<vmem>>, vector<1x16x128xf32>
    %86 = vector.shape_cast %85 : vector<1x16x128xf32> to vector<16x128xf32>
    %87 = vector.shape_cast %84 : vector<16x128xf32> to vector<1x16x128xf32>
    tpu.vector_store %arg4[%c0_24, %c0_25, %c0_26], %87 {strides = array<i32>} : memref<1x16x128xf32, #tpu.memory_space<vmem>>, vector<1x16x128xf32>,
    return
  }
  func.func @transform_0(%arg0: i32) -> (i32, i32, i32) {
    %c0_i32 = arith.constant 0 : i32
    %c0_i32_0 = arith.constant 0 : i32
    %c0_i32_1 = arith.constant 0 : i32
    return %arg0, %c0_i32, %c0_i32_0 : i32, i32, i32
  }
  func.func @transform_1(%arg0: i32) -> (i32, i32) {
    %c0_i32 = arith.constant 0 : i32
    %c0_i32_0 = arith.constant 0 : i32
    %c0_i32_1 = arith.constant 0 : i32
    return %c0_i32, %c0_i32_0 : i32, i32
  }
  func.func @transform_2(%arg0: i32) -> (i32, i32) {
    %c0_i32 = arith.constant 0 : i32
    %c0_i32_0 = arith.constant 0 : i32
    %c0_i32_1 = arith.constant 0 : i32
    return %c0_i32, %c0_i32_0 : i32, i32
  }
  func.func @transform_3(%arg0: i32) -> (i32, i32, i32) {
    %c0_i32 = arith.constant 0 : i32
    %c0_i32_0 = arith.constant 0 : i32
    %c0_i32_1 = arith.constant 0 : i32
    return %arg0, %c0_i32, %c0_i32_0 : i32, i32, i32
  }
}

</mosaic_0001>

<bundles_post_ra>
// kernel: encoder_forward.2
= control target key start
LH: loop header
LB: loop body
LE: loop exit
PB: predicated region body
PF: predicated region fallthrough
CT: control target
= control target key end

     0   :  { %s975_s12 = smov 0   ;;  %s1295_s0 = inlined_call_operand.vmem [shape: bf16[2,64,256], index: 0, kind: input, shape index: {}]   ;;  %s1296_s1 = inlined_call_operand.vmem [shape: bf16[256,128], index: 1, kind: input, shape index: {}]   ;;  %s1297_s2 = inlined_call_operand.vmem [shape: f32[8,128], index: 2, kind: input, shape index: {}]   ;;  %s1298_s3 = inlined_call_operand.vmem [shape: f32[2,64,128], index: 3, kind: output, shape index: {}]  }
   0x1 LB: > { %s746_s13 = sadd.s32 4294967295, %s953_s12   ;;  %p750_p0 = scmp.ge.s32.totalorder %s953_s12, 1  ;;  %s953_s12 = sphi %s975_s12, %s13_s12  }
   0x2   : > { %p137_p1 = scmp.lt.s32.totalorder %s953_s12, 3 }
   0x4   : > { %p138_p2 = pnand %p750_p0, %p137_p1 }
   0x5   : > { %p161_p3 = scmp.lt.s32.totalorder (!%p138_p2), %s746_s13, 1 }
   0x6   : > { %141 = sbr.rel (%p138_p2) target bundleno = 586 (0x24a), region = 32 }
   0xb   : > { %v878_v0 = vld [vmem:[%s1296_s1 + $0x38] sm:$0xff]  ;;  %v877_v2 = vld [vmem:[%s1296_s1 + $0x30] sm:$0xff]  ;;  %v876_v4 = vld [vmem:[%s1296_s1 + $0x28] sm:$0xff]  ;;  %s1318_s13 = smov (!%p161_p3, %s746_s13), 1 }
   0xc   : > { %v886_v1 = vld [vmem:[%s1296_s1 + $0x78] sm:$0xff]  ;;  %349 = vmatpush.bf16.msra.mxu0 %v878_v0  ;;  %887 = vmatpush.bf16.msra.mxu2 %v878_v0  ;;  %v885_v3 = vld [vmem:[%s1296_s1 + $0x70] sm:$0xff]  ;;  %v884_v5 = vld [vmem:[%s1296_s1 + $0x68] sm:$0xff]  ;;  %s861_s11 = sshll.u32 %s1318_s13, 6 }
   0xd   : > { %378 = vmatpush.bf16.msra.mxu1 %v886_v1  ;;  %895 = vmatpush.bf16.msra.mxu3 %v886_v1  ;;  %v875_v6 = vld [vmem:[%s1296_s1 + $0x20] sm:$0xff]  ;;  %v874_v8 = vld [vmem:[%s1296_s1 + $0x18] sm:$0xff]  ;;  %v873_v10 = vld [vmem:[%s1296_s1 + $0x10] sm:$0xff]  ;;  %s1034_s18 = scalar_lea.vmem %s1295_s0, %s861_s11  ;;  %s1263_s29 = scalar_lea.vmem %s1298_s3, %s861_s11 }
   0xe   : > { %v883_v7 = vld [vmem:[%s1296_s1 + $0x60] sm:$0xff]  ;;  %v882_v9 = vld [vmem:[%s1296_s1 + $0x58] sm:$0xff]  ;;  %v881_v11 = vld [vmem:[%s1296_s1 + $0x50] sm:$0xff] }
   0xf   : > { %v872_v12 = vld [vmem:[%s1296_s1 + $0x8] sm:$0xff]  ;;  %v871_v14 = vld [vmem:[%s1296_s1] sm:$0xff]  ;;  %v765_v28 = vld [vmem:[%s1034_s18 + $0x10] sm:$0xf] }
  0x10   : > { %350 = vmatpush.bf16.msra.mxu0 %v877_v2  ;;  %888 = vmatpush.bf16.msra.mxu2 %v877_v2  ;;  %v880_v13 = vld [vmem:[%s1296_s1 + $0x48] sm:$0xff]  ;;  %v879_v15 = vld [vmem:[%s1296_s1 + $0x40] sm:$0xff]  ;;  %v866_v29 = vld [vmem:[%s1034_s18 + $0x14] sm:$0xf0] }
  0x11   : > { %379 = vmatpush.bf16.msra.mxu1 %v885_v3  ;;  %896 = vmatpush.bf16.msra.mxu3 %v885_v3  ;;  %v757_v16 = vld [vmem:[%s1034_s18] sm:$0xf]  ;;  %v864_v17 = vld [vmem:[%s1034_s18 + $0x4] sm:$0xf0]  ;;  %v863_v20 = vld [vmem:[%s1034_s18 + $0x4] sm:$0xf]  ;;  %v766_v36 = vor.u32 %v866_v29, %v765_v28 }
  0x12   : > { %v773_v18 = vld [vmem:[%s1034_s18 + $0x20] sm:$0xf]  ;;  %v868_v19 = vld [vmem:[%s1034_s18 + $0x24] sm:$0xf0]  ;;  %v759_v21 = vld [vmem:[%s1034_s18 + $0x8] sm:$0xf0]  ;;  %v758_v24 = vor.u32 %v864_v17, %v757_v16  ;;  %v407_v16 = vlaneseq }
  0x13   : > { %v867_v22 = vld [vmem:[%s1034_s18 + $0x24] sm:$0xf]  ;;  %v775_v23 = vld [vmem:[%s1034_s18 + $0x28] sm:$0xf0]  ;;  %v774_v25 = vor.u32 %v868_v19, %v773_v18  ;;  %v762_v26 = vor.u32 %v863_v20, %v759_v21  ;;  %v781_v30 = vld [vmem:[%s1034_s18 + $0x30] sm:$0xf] }
  0x14   : > { %351 = vmatpush.bf16.msra.mxu0 %v876_v4  ;;  %889 = vmatpush.bf16.msra.mxu2 %v876_v4  ;;  %v778_v27 = vor.u32 %v867_v22, %v775_v23  ;;  %v870_v31 = vld [vmem:[%s1034_s18 + $0x34] sm:$0xf0]  ;;  %v865_v32 = vld [vmem:[%s1034_s18 + $0x14] sm:$0xf]  ;;  %v767_v33 = vld [vmem:[%s1034_s18 + $0x18] sm:$0xf0] }
  0x15   : > { %380 = vmatpush.bf16.msra.mxu1 %v884_v5  ;;  %897 = vmatpush.bf16.msra.mxu3 %v884_v5  ;;  %v869_v34 = vld [vmem:[%s1034_s18 + $0x34] sm:$0xf]  ;;  %v783_v35 = vld [vmem:[%s1034_s18 + $0x38] sm:$0xf0]  ;;  %v782_v37 = vor.u32 %v870_v31, %v781_v30  ;;  %v770_v38 = vor.u32 %v865_v32, %v767_v33  ;;  %v1064_v46 = vld [vmem:[%s1297_s2] sm:$0xff]  ;;  %v408_v19 = vand.u32 127, %v407_v16 }
  0x16   : > { %v786_v39 = vor.u32 %v869_v34, %v783_v35  ;;  %v212_v48 = vperm.slane %v1064_v46, 0 }
  0x17   : > { %v413_v22 = vand.u32 31, %v408_v19 }
  0x18   : > { %352 = vmatpush.bf16.msra.mxu0 %v875_v6  ;;  %890 = vmatpush.bf16.msra.mxu2 %v875_v6 }
  0x19   : > { %381 = vmatpush.bf16.msra.mxu1 %v883_v7  ;;  %898 = vmatpush.bf16.msra.mxu3 %v883_v7  ;;  %vm1067_vm0 = vcmp.lt.s32.totalorder %v413_v22, 16 }
  0x1c   : > { %353 = vmatpush.bf16.msra.mxu0 %v874_v8  ;;  %891 = vmatpush.bf16.msra.mxu2 %v874_v8 }
  0x1d   : > { %382 = vmatpush.bf16.msra.mxu1 %v882_v9  ;;  %899 = vmatpush.bf16.msra.mxu3 %v882_v9 }
  0x20   : > { %354 = vmatpush.bf16.msra.mxu0 %v873_v10  ;;  %892 = vmatpush.bf16.msra.mxu2 %v873_v10 }
  0x21   : > { %383 = vmatpush.bf16.msra.mxu1 %v881_v11  ;;  %900 = vmatpush.bf16.msra.mxu3 %v881_v11 }
  0x24   : > { %355 = vmatpush.bf16.msra.mxu0 %v872_v12  ;;  %893 = vmatpush.bf16.msra.mxu2 %v872_v12 }
  0x25   : > { %384 = vmatpush.bf16.msra.mxu1 %v880_v13  ;;  %901 = vmatpush.bf16.msra.mxu3 %v880_v13 }
  0x28   : > { %356 = vmatpush.bf16.msra.mxu0 %v871_v14  ;;  %894 = vmatpush.bf16.msra.mxu2 %v871_v14 }
  0x29   : > { %385 = vmatpush.bf16.msra.mxu1 %v879_v15  ;;  %902 = vmatpush.bf16.msra.mxu3 %v879_v15 }
  0x2b   : > { %357 = vmatmul.bf16.vlgmr.msra.gmra.mxu0 %v758_v24  ;;  %367 = vmatmul.bf16.vlgmr.msra.gmra.mxu2 %v774_v25 }
  0x2c   : > { %386 = vmatmul.bf16.vlgmr.msra.gmra.mxu1 %v762_v26  ;;  %396 = vmatmul.bf16.vlgmr.msra.gmra.mxu3 %v778_v27 }
  0x3b   : > { %362 = vmatmul.bf16.gmra.mxu0 %v766_v36  ;;  %372 = vmatmul.bf16.gmra.mxu2 %v782_v37 }
  0x3c   : > { %391 = vmatmul.bf16.gmra.mxu1 %v770_v38  ;;  %401 = vmatmul.bf16.gmra.mxu3 %v786_v39 }
  0xa8   : > { %v358_v40 = vpop.f32.mrf.mxu0 }
  0xa9   : > { %v387_v41 = vpop.f32.mrf.mxu1  ;;  %v359_v53 = vadd.f32 %v358_v40, %v212_v48 }
  0xab   : > { %v388_v57 = vadd.f32 %v387_v41, %v359_v53 }
  0xae   : > { %v368_v42 = vpop.f32.mrf.mxu2 }
  0xaf   : > { %v397_v43 = vpop.f32.mrf.mxu3  ;;  %v369_v61 = vadd.f32 %v368_v42, %v212_v48 }
  0xb0   : > { %v360_v44 = vpop.f32.mrf.mxu0 }
  0xb1   : > { %v389_v45 = vpop.f32.mrf.mxu1  ;;  %v361_v51 = vadd.f32 %v360_v44, %v212_v48  ;;  %v398_v4 = vadd.f32 %v397_v43, %v369_v61 }
  0xb3   : > { %v390_v55 = vadd.f32 %v389_v45, %v361_v51 }
  0xb5   : > { %v422_v62 = vadd.f32 %v390_v55, %v388_v57 }
  0xb6   : > { %v370_v47 = vpop.f32.mrf.mxu2 }
  0xb7   : > { %v399_v49 = vpop.f32.mrf.mxu3  ;;  %v371_v1 = vadd.f32 %v370_v47, %v212_v48 }
  0xb8   : > { %v363_v50 = vpop.f32.mrf.mxu0 }
  0xb9   : > { %v392_v52 = vpop.f32.mrf.mxu1  ;;  %v364_v54 = vadd.f32 %v363_v50, %v212_v48  ;;  %v400_v8 = vadd.f32 %v399_v49, %v371_v1 }
  0xbb   : > { %v393_v58 = vadd.f32 %v392_v52, %v364_v54 }
  0xbd   : > { %v423_v2 = vadd.f32 %v422_v62, %v393_v58 }
  0xbe   : > { %v373_v56 = vpop.f32.mrf.mxu2 }
  0xbf   : > { %v402_v59 = vpop.f32.mrf.mxu3  ;;  %v374_v5 = vadd.f32 %v373_v56, %v212_v48 }
  0xc0   : > { %v365_v60 = vpop.f32.mrf.mxu0 }
  0xc1   : > { %v366_v63 = vadd.f32 %v365_v60, %v212_v48  ;;  %v394_v0 = vpop.f32.mrf.mxu1  ;;  %v403_v11 = vadd.f32 %v402_v59, %v374_v5 }
  0xc3   : > { %v395_v3 = vadd.f32 %v394_v0, %v366_v63 }
  0xc5   : > { %v424_v6 = vadd.f32 %v423_v2, %v395_v3 }
  0xc6   : > { %v375_v7 = vpop.f32.mrf.mxu2 }
  0xc7   : > { %v425_v9 = vadd.f32 %v424_v6, %v398_v4  ;;  %v376_v10 = vadd.f32 %v375_v7, %v212_v48  ;;  %v404_v13 = vpop.f32.mrf.mxu3 }
  0xc9   : > { %v426_v12 = vadd.f32 %v425_v9, %v400_v8  ;;  %v405_v14 = vadd.f32 %v404_v13, %v376_v10 }
  0xcb   : > { %v427_v15 = vadd.f32 %v426_v12, %v403_v11 }
  0xcd   : > { %v428_v17 = vadd.f32 %v427_v15, %v405_v14 }
  0xcf   : > { %v429_v18 = vrot.slane %v428_v17, 4 }
  0xd1   : > { %v430_v20 = vadd.f32 %v429_v18, %v428_v17 }
  0xd3   : > { %v431_v21 = vrot.slane %v430_v20, 2 }
  0xd5   : > { %v432_v23 = vadd.f32 %v431_v21, %v430_v20 }
  0xd7   : > { %v433_v24 = vrot.slane %v432_v23, 1 }
  0xd9   : > { %v434_v26 = vadd.f32 %v433_v24, %v432_v23  ;;  %v514_v24 = vperm.slane %v1064_v46, 2 }
  0xdb   : > { %v435_v27 = vsel %vm1067_vm0, %v434_v26, 0.0 }
  0xdc   : > { %436 = vadd.xlane.f32.xlu0 %v435_v27 }
  0xe4   : > { %438 = vadd.xlane.f32.xlu0 %v434_v26 }
 0x14f   : > { %v437_v28 = vpop.xlane.xlu0 %436 }
 0x150   : > { %v441_v31 = vmul.f32 0.00024414063, %v437_v28 }
 0x157   : > { %v439_v29 = vpop.xlane.xlu0 %438 }
 0x158   : > { %v440_v30 = vsub.f32 %v439_v29, %v437_v28 }
 0x15a   : > { %v442_v32 = vmul.f32 0.00024414063, %v440_v30 }
 0x15c   : > { %v443_v33 = vsel %vm1067_vm0, %v441_v31, %v442_v32 }
 0x15d   : > { %v1075_v34 = vsub.f32 %v388_v57, %v443_v33  ;;  %v1077_v35 = vsub.f32 %v390_v55, %v443_v33  ;;  %v1079_v36 = vsub.f32 %v393_v58, %v443_v33  ;;  %v1081_v37 = vsub.f32 %v395_v3, %v443_v33 }
 0x15e   : > { %v1087_v40 = vsub.f32 %v398_v4, %v443_v33  ;;  %v449_v43 = vsub.f32 %v400_v8, %v443_v33  ;;  %v450_v47 = vsub.f32 %v403_v11, %v443_v33  ;;  %v451_v50 = vsub.f32 %v405_v14, %v443_v33 }
 0x15f   : > { %v452_v38 = vmul.f32 %v1075_v34, %v1075_v34  ;;  %v453_v39 = vmul.f32 %v1077_v35, %v1077_v35  ;;  %v454_v41 = vmul.f32 %v1079_v36, %v1079_v36  ;;  %v455_v44 = vmul.f32 %v1081_v37, %v1081_v37 }
 0x160   : > { %v456_v48 = vmul.f32 %v1087_v40, %v1087_v40  ;;  %v457_v51 = vmul.f32 %v449_v43, %v449_v43  ;;  %v458_v53 = vmul.f32 %v450_v47, %v450_v47  ;;  %v459_v55 = vmul.f32 %v451_v50, %v451_v50 }
 0x161   : > { %v460_v42 = vadd.f32 %v453_v39, %v452_v38 }
 0x163   : > { %v461_v45 = vadd.f32 %v460_v42, %v454_v41 }
 0x165   : > { %v462_v49 = vadd.f32 %v461_v45, %v455_v44 }
 0x167   : > { %v463_v52 = vadd.f32 %v462_v49, %v456_v48 }
 0x169   : > { %v464_v54 = vadd.f32 %v463_v52, %v457_v51 }
 0x16b   : > { %v465_v56 = vadd.f32 %v464_v54, %v458_v53 }
 0x16d   : > { %v466_v57 = vadd.f32 %v465_v56, %v459_v55 }
 0x16f   : > { %v467_v58 = vrot.slane %v466_v57, 4 }
 0x171   : > { %v468_v59 = vadd.f32 %v467_v58, %v466_v57 }
 0x173   : > { %v469_v60 = vrot.slane %v468_v59, 2 }
 0x175   : > { %v470_v61 = vadd.f32 %v469_v60, %v468_v59 }
 0x177   : > { %v471_v62 = vrot.slane %v470_v61, 1 }
 0x179   : > { %v472_v63 = vadd.f32 %v471_v62, %v470_v61 }
 0x17b   : > { %v473_v0 = vsel %vm1067_vm0, %v472_v63, 0.0 }
 0x17c   : > { %474 = vadd.xlane.f32.xlu1 %v473_v0 }
 0x184   : > { %476 = vadd.xlane.f32.xlu1 %v472_v63 }
 0x1ef   : > { %v475_v1 = vpop.xlane.xlu1 %474 }
 0x1f0   : > { %v479_v2 = vmul.f32 0.00024414063, %v475_v1 }
 0x1f2   : > { %v480_v3 = vadd.f32 1e-05, %v479_v2 }
 0x1f4   : > { %911 = vrsqrt.f32 %v480_v3  ;;  %vm487_vm3 = vweird.f32 %v480_v3 }
 0x1f7   : > { %v477_v4 = vpop.xlane.xlu1 %476 }
 0x1f8   : > { %v478_v5 = vsub.f32 %v477_v4, %v475_v1 }
 0x1fa   : > { %v912_v6 = vpop.eup %911  ;;  %v491_v7 = vmul.f32 0.00024414063, %v478_v5 }
 0x1fb   : > { %v482_v8 = vmul.f32 %v912_v6, %v480_v3  ;;  %vm488_vm1 = vweird.f32 %v912_v6 }
 0x1fc   : > { %v492_v9 = vadd.f32 1e-05, %v491_v7  ;;  %vm489_vm4 = vmor %vm487_vm3, %vm488_vm1 }
 0x1fd   : > { %v483_v10 = vmul.f32 %v912_v6, %v482_v8 }
 0x1fe   : > { %913 = vrsqrt.f32 %v492_v9  ;;  %vm499_vm5 = vweird.f32 %v492_v9 }
 0x1ff   : > { %v484_v11 = vmul.f32 0.5, %v483_v10 }
 0x201   : > { %v485_v14 = vsub.f32 1.5, %v484_v11 }
 0x203   : > { %v486_v17 = vmul.f32 %v912_v6, %v485_v14 }
 0x204   : > { %v914_v12 = vpop.eup %913 }
 0x205   : > { %v494_v13 = vmul.f32 %v914_v12, %v492_v9  ;;  %vm500_vm2 = vweird.f32 %v914_v12  ;;  %v490_v20 = vsel %vm489_vm4, %v912_v6, %v486_v17 }
 0x206   : > { %vm501_vm6 = vmor %vm499_vm5, %vm500_vm2 }
 0x207   : > { %v495_v15 = vmul.f32 %v914_v12, %v494_v13 }
 0x209   : > { %v496_v16 = vmul.f32 0.5, %v495_v15 }
 0x20b   : > { %v497_v18 = vsub.f32 1.5, %v496_v16 }
 0x20d   : > { %v498_v19 = vmul.f32 %v914_v12, %v497_v18 }
 0x20f   : > { %v502_v21 = vsel %vm501_vm6, %v914_v12, %v498_v19 }
 0x210   : > { %v503_v22 = vsel %vm1067_vm0, %v490_v20, %v502_v21 }
 0x211   : > { %v504_v23 = vmul.f32 %v503_v22, %v1064_v46 }
 0x213   : > { %v505_v26 = vperm.slane %v504_v23, 1 }
 0x215   : > { %v506_v27 = vmul.f32 %v505_v26, %v1075_v34  ;;  %v507_v28 = vmul.f32 %v505_v26, %v1077_v35  ;;  %v508_v29 = vmul.f32 %v505_v26, %v1079_v36  ;;  %v509_v30 = vmul.f32 %v505_v26, %v1081_v37 }
 0x216   : > { %v510_v31 = vmul.f32 %v505_v26, %v1087_v40  ;;  %v511_v32 = vmul.f32 %v505_v26, %v449_v43  ;;  %v512_v33 = vmul.f32 %v505_v26, %v450_v47  ;;  %v513_v38 = vmul.f32 %v505_v26, %v451_v50 }
 0x217   : > { %v1106_v25 = vadd.f32 %v514_v24, %v506_v27  ;;  %v1108_v39 = vadd.f32 %v514_v24, %v507_v28  ;;  %v1110_v41 = vadd.f32 %v514_v24, %v508_v29  ;;  %v1112_v46 = vadd.f32 %v514_v24, %v509_v30 }
 0x218   : > { %v1114_v34 = vadd.f32 %v514_v24, %v510_v31  ;;  %v1116_v35 = vadd.f32 %v514_v24, %v511_v32  ;;  %v1121_v42 = vadd.f32 %v514_v24, %v512_v33  ;;  %v1124_v44 = vadd.f32 %v514_v24, %v513_v38 }
 0x219   : > { %v851_v36 = vmul.f32 -1.442695, %v1106_v25  ;;  %v852_v37 = vmul.f32 -1.442695, %v1108_v39  ;;  %v853_v40 = vmul.f32 -1.442695, %v1110_v41 }
 0x21a   : > { %v854_v43 = vmul.f32 -1.442695, %v1112_v46  ;;  %v855_v45 = vmul.f32 -1.442695, %v1114_v34  ;;  %v856_v47 = vmul.f32 -1.442695, %v1116_v35 }
 0x21b   : > { %915 = vpow2.f32 %v851_v36  ;;  %v857_v48 = vmul.f32 -1.442695, %v1121_v42  ;;  %v858_v49 = vmul.f32 -1.442695, %v1124_v44 }
 0x21c   : > { %917 = vpow2.f32 %v852_v37 }
 0x21d   : > { %919 = vpow2.f32 %v853_v40 }
 0x21e   : > { %921 = vpow2.f32 %v854_v43 }
 0x21f   : > { %923 = vpow2.f32 %v855_v45 }
 0x220   : > { %925 = vpow2.f32 %v856_v47 }
 0x221   : > { %v916_v50 = vpop.eup %915  ;;  %927 = vpow2.f32 %v857_v48 }
 0x222   : > { %v918_v51 = vpop.eup %917  ;;  %v1130_v52 = vadd.f32 1.0, %v916_v50  ;;  %929 = vpow2.f32 %v858_v49 }
 0x223   : > { %v920_v53 = vpop.eup %919  ;;  %v1132_v54 = vadd.f32 1.0, %v918_v51 }
 0x224   : > { %v922_v55 = vpop.eup %921  ;;  %v1134_v56 = vadd.f32 1.0, %v920_v53  ;;  %931 = vrcp.f32 %v1130_v52  ;;  %v566_v61 = vand.u32 2147483648, %v1130_v52  ;;  %vm560_vm7 = vweird.f32 %v1130_v52 }
 0x225   : > { %v924_v57 = vpop.eup %923  ;;  %v1137_v58 = vadd.f32 1.0, %v922_v55  ;;  %933 = vrcp.f32 %v1132_v54  ;;  %v581_v63 = vand.u32 2147483648, %v1132_v54  ;;  %v564_v3 = vand.u32 2147483647, %v1130_v52 }
 0x226   : > { %v926_v59 = vpop.eup %925  ;;  %v1140_v60 = vadd.f32 1.0, %v924_v57  ;;  %935 = vrcp.f32 %v1134_v56  ;;  %v567_v6 = vor.u32 1.1754944e-38, %v566_v61  ;;  %vm575_vm8 = vweird.f32 %v1132_v54 }
 0x227   : > { %v928_v62 = vpop.eup %927  ;;  %v1145_v1 = vadd.f32 1.0, %v926_v59  ;;  %937 = vrcp.f32 %v1137_v58  ;;  %v579_v7 = vand.u32 2147483647, %v1132_v54  ;;  %v596_v8 = vand.u32 2147483648, %v1134_v56 }
 0x228   : > { %v930_v0 = vpop.eup %929  ;;  %939 = vrcp.f32 %v1140_v60  ;;  %v1160_v9 = vadd.f32 1.0, %v928_v62  ;;  %v582_v11 = vor.u32 1.1754944e-38, %v581_v63  ;;  %vm590_vm9 = vweird.f32 %v1134_v56 }
 0x229   : > { %v594_v12 = vand.u32 2147483647, %v1134_v56  ;;  %v1168_v14 = vadd.f32 1.0, %v930_v0  ;;  %v609_v16 = vand.u32 2147483647, %v1137_v58  ;;  %941 = vrcp.f32 %v1145_v1 }
 0x22a   : > { %v1148_v2 = vpop.eup %931  ;;  %vm1173_vm11 = vcmp.eq.f32.partialorder %v564_v3, 8.507059e+37  ;;  %vm605_vm12 = vweird.f32 %v1137_v58  ;;  %v611_v20 = vand.u32 2147483648, %v1137_v58  ;;  %vm1182_vm13 = vcmp.eq.f32.partialorder %v579_v7, 8.507059e+37 }
 0x22b   : > { %v1153_v4 = vpop.eup %933  ;;  %v556_v5 = vmul.f32 %v1148_v2, %v1130_v52  ;;  %vm561_vm10 = vweird.f32 %v1148_v2  ;;  %v597_v24 = vor.u32 1.1754944e-38, %v596_v8  ;;  %vm620_vm14 = vweird.f32 %v1140_v60 }
 0x22c   : > { %v571_v10 = vmul.f32 %v1153_v4, %v1132_v54  ;;  %v1166_v13 = vpop.eup %935  ;;  %v624_v26 = vand.u32 2147483647, %v1140_v60  ;;  %vm576_vm15 = vweird.f32 %v1153_v4  ;;  %vm1190_vm0 = vcmp.eq.f32.partialorder %v594_v12, 8.507059e+37  ;;  %vm1209_vm3 = vmor %vm560_vm7, %vm561_vm10 }
 0x22d   : > { %v557_v15 = vsub.f32 1.0, %v556_v5  ;;  %v586_v19 = vmul.f32 %v1166_v13, %v1134_v56  ;;  %v938_v21 = vpop.eup %937  ;;  %vm1196_vm1 = vcmp.eq.f32.partialorder %v609_v16, 8.507059e+37  ;;  %v626_v36 = vand.u32 2147483648, %v1140_v60  ;;  %vm1225_vm5 = vmor %vm575_vm8, %vm576_vm15 }
 0x22e   : > { %v572_v18 = vsub.f32 1.0, %v571_v10  ;;  %v940_v27 = vpop.eup %939  ;;  %v601_v31 = vmul.f32 %v938_v21, %v1137_v58  ;;  %vm591_vm2 = vweird.f32 %v1166_v13  ;;  %v612_v48 = vor.u32 1.1754944e-38, %v611_v20 }
 0x22f   : > { %v558_v22 = vmul.f32 %v1148_v2, %v557_v15  ;;  %v587_v29 = vsub.f32 1.0, %v586_v19  ;;  %v616_v38 = vmul.f32 %v940_v27, %v1140_v60  ;;  %v942_v45 = vpop.eup %941  ;;  %vm1213_vm4 = vcmp.eq.f32.partialorder %v624_v26, 8.507059e+37  ;;  %vm1235_vm7 = vmor %vm590_vm9, %vm591_vm2 }
 0x230   : > { %v573_v28 = vmul.f32 %v1153_v4, %v572_v18  ;;  %v602_v43 = vsub.f32 1.0, %v601_v31  ;;  %943 = vrcp.f32 %v1160_v9  ;;  %vm606_vm6 = vweird.f32 %v938_v21 }
 0x231   : > { %v559_v32 = vadd.f32 %v1148_v2, %v558_v22  ;;  %v588_v40 = vmul.f32 %v1166_v13, %v587_v29  ;;  %v617_v49 = vsub.f32 1.0, %v616_v38  ;;  %vm621_vm10 = vweird.f32 %v940_v27  ;;  %vm607_vm8 = vmor %vm605_vm12, %vm606_vm6 }
 0x232   : > { %v574_v37 = vadd.f32 %v1153_v4, %v573_v28  ;;  %v603_v55 = vmul.f32 %v938_v21, %v602_v43  ;;  %v631_v54 = vmul.f32 %v942_v45, %v1145_v1  ;;  %v627_v0 = vor.u32 1.1754944e-38, %v626_v36  ;;  %vm622_vm9 = vmor %vm620_vm14, %vm621_vm10 }
 0x233   : > { %v563_v51 = vsel %vm1209_vm3, %v1148_v2, %v559_v32  ;;  %v589_v53 = vadd.f32 %v1166_v13, %v588_v40  ;;  %v618_v61 = vmul.f32 %v940_v27, %v617_v49  ;;  %v639_v2 = vand.u32 2147483647, %v1145_v1 }
 0x234   : > { %v578_v57 = vsel %vm1225_vm5, %v1153_v4, %v574_v37  ;;  %v604_v63 = vadd.f32 %v938_v21, %v603_v55  ;;  %v568_v56 = vsel %vm1173_vm11, %v567_v6, %v563_v51  ;;  %v632_v4 = vsub.f32 1.0, %v631_v54 }
 0x235   : > { %v593_v62 = vsel %vm1235_vm7, %v1166_v13, %v589_v53  ;;  %v619_v3 = vadd.f32 %v940_v27, %v618_v61  ;;  %v641_v5 = vand.u32 2147483648, %v1145_v1  ;;  %v583_v7 = vsel %vm1182_vm13, %v582_v11, %v578_v57 }
 0x236   : > { %v608_v8 = vsel %vm607_vm8, %v938_v21, %v604_v63  ;;  %vm636_vm15 = vweird.f32 %v942_v45  ;;  %945 = vrcp.f32 %v1168_v14  ;;  %v944_v10 = vpop.eup %943  ;;  %v598_v6 = vsel %vm1190_vm0, %v597_v24, %v593_v62 }
 0x237   : > { %v613_v58 = vsel %vm1196_vm1, %v612_v48, %v608_v8  ;;  %v623_v12 = vsel %vm622_vm9, %v940_v27, %v619_v3  ;;  %v633_v13 = vmul.f32 %v942_v45, %v632_v4  ;;  %v646_v11 = vmul.f32 %v944_v10, %v1160_v9 }
 0x238   : > { %v628_v60 = vsel %vm1213_vm4, %v627_v0, %v623_v12  ;;  %vm635_vm11 = vweird.f32 %v1145_v1  ;;  %v675_v16 = vmul.f32 %v568_v56, %v1106_v25  ;;  %v676_v17 = vmul.f32 %v583_v7, %v1108_v39 }
 0x239   : > { %v634_v15 = vadd.f32 %v942_v45, %v633_v13  ;;  %vm637_vm12 = vmor %vm635_vm11, %vm636_vm15  ;;  %v642_v18 = vor.u32 1.1754944e-38, %v641_v5  ;;  %v647_v19 = vsub.f32 1.0, %v646_v11  ;;  %v677_v20 = vmul.f32 %v598_v6, %v1110_v41 }
 0x23a   : > { %v678_v21 = vmul.f32 %v613_v58, %v1112_v46  ;;  %vm640_vm13 = vcmp.eq.f32.partialorder %v639_v2, 8.507059e+37  ;;  %v656_v23 = vand.u32 2147483648, %v1160_v9  ;;  %v679_v1 = vmul.f32 %v628_v60, %v1114_v34  ;;  %683 = vst [vmem:[%s1263_s29] sm:$0xff] %v675_v16 }
 0x23b   : > { %v638_v22 = vsel %vm637_vm12, %v942_v45, %v634_v15  ;;  %v648_v24 = vmul.f32 %v944_v10, %v647_v19  ;;  %vm651_vm14 = vweird.f32 %v944_v10  ;;  %v654_v26 = vand.u32 2147483647, %v1160_v9  ;;  %684 = vst [vmem:[%s1263_s29 + $0x8] sm:$0xff] %v676_v17 }
 0x23c   : > { %v946_v25 = vpop.eup %945  ;;  %v643_v39 = vsel %vm640_vm13, %v642_v18, %v638_v22  ;;  %685 = vst [vmem:[%s1263_s29 + $0x10] sm:$0xff] %v677_v20  ;;  %vm650_vm0 = vweird.f32 %v1160_v9  ;;  %v657_v34 = vor.u32 1.1754944e-38, %v656_v23  ;;  %v671_v30 = vand.u32 2147483648, %v1168_v14 }
 0x23d   : > { %v661_v41 = vmul.f32 %v946_v25, %v1168_v14  ;;  %v680_v46 = vmul.f32 %v643_v39, %v1116_v35  ;;  %v649_v27 = vadd.f32 %v944_v10, %v648_v24  ;;  %686 = vst [vmem:[%s1263_s29 + $0x18] sm:$0xff] %v678_v21  ;;  %vm652_vm1 = vmor %vm650_vm0, %vm651_vm14  ;;  %vm655_vm2 = vcmp.eq.f32.partialorder %v654_v26, 8.507059e+37 }
 0x23e   : > { %687 = vst [vmem:[%s1263_s29 + $0x20] sm:$0xff] %v679_v1  ;;  %vm666_vm3 = vweird.f32 %v946_v25  ;;  %v669_v35 = vand.u32 2147483647, %v1168_v14  ;;  %vm665_vm4 = vweird.f32 %v1168_v14  ;;  %v672_v38 = vor.u32 1.1754944e-38, %v671_v30 }
 0x23f   : > { %v662_v28 = vsub.f32 1.0, %v661_v41  ;;  %v653_v29 = vsel %vm652_vm1, %v944_v10, %v649_v27  ;;  %688 = vst [vmem:[%s1263_s29 + $0x28] sm:$0xff] %v680_v46  ;;  %vm667_vm5 = vmor %vm665_vm4, %vm666_vm3 }
 0x240   : > { %v658_v31 = vsel %vm655_vm2, %v657_v34, %v653_v29  ;;  %vm670_vm6 = vcmp.eq.f32.partialorder %v669_v35, 8.507059e+37 }
 0x241   : > { %v663_v32 = vmul.f32 %v946_v25, %v662_v28  ;;  %v681_v33 = vmul.f32 %v658_v31, %v1121_v42 }
 0x243   : > { %v664_v9 = vadd.f32 %v946_v25, %v663_v32  ;;  %689 = vst [vmem:[%s1263_s29 + $0x30] sm:$0xff] %v681_v33 }
 0x245   : > { %v668_v36 = vsel %vm667_vm5, %v946_v25, %v664_v9 }
 0x246   : > { %v673_v37 = vsel %vm670_vm6, %v672_v38, %v668_v36 }
 0x247   : > { %v682_v40 = vmul.f32 %v673_v37, %v1124_v44 }
 0x249   : > { %690 = vst [vmem:[%s1263_s29 + $0x38] sm:$0xff] %v682_v40 }
 0x24a PF: > { %s13_s12 = sadd.s32 1, %s953_s12  }
 0x24b   : > { %p10_p4 = scmp.ge.s32.totalorder %s13_s12, 4  }
 0x24d   :  { %12 = sbr.rel (!%p10_p4) target bundleno = 1 (0x1), region = 62 }

// kernel: encoder_forward.3
= control target key start
LH: loop header
LB: loop body
LE: loop exit
PB: predicated region body
PF: predicated region fallthrough
CT: control target
= control target key end

     0   :  { %s1575_s12 = smov 0   ;;  %s1856_s0 = inlined_call_operand.vmem [shape: bf16[2,16,1152], index: 0, kind: input, shape index: {}]   ;;  %s1857_s1 = inlined_call_operand.vmem [shape: bf16[1152,128], index: 1, kind: input, shape index: {}]   ;;  %s1858_s2 = inlined_call_operand.vmem [shape: f32[8,128], index: 2, kind: input, shape index: {}]   ;;  %s1859_s3 = inlined_call_operand.vmem [shape: f32[2,16,128], index: 3, kind: output, shape index: {}]  }
   0x1 LB: > { %s1108_s13 = sadd.s32 4294967295, %s1553_s12   ;;  %p1112_p0 = scmp.ge.s32.totalorder %s1553_s12, 1  ;;  %s1553_s12 = sphi %s1575_s12, %s13_s12  }
   0x2   : > { %p137_p1 = scmp.lt.s32.totalorder %s1553_s12, 3 }
   0x4   : > { %p138_p2 = pnand %p1112_p0, %p137_p1 }
   0x5   : > { %p161_p3 = scmp.lt.s32.totalorder (!%p138_p2), %s1108_s13, 1 }
   0x6   : > { %141 = sbr.rel (%p138_p2) target bundleno = 595 (0x253), region = 32 }
   0xb   : > { %v1461_v0 = vld [vmem:[%s1857_s1 + $0x38] sm:$0xff]  ;;  %v1460_v4 = vld [vmem:[%s1857_s1 + $0x30] sm:$0xff]  ;;  %v1459_v8 = vld [vmem:[%s1857_s1 + $0x28] sm:$0xff]  ;;  %s1863_s13 = smov (!%p161_p3, %s1108_s13), 1 }
   0xc   : > { %v1477_v1 = vld [vmem:[%s1857_s1 + $0xb8] sm:$0xff]  ;;  %805 = vmatpush.bf16.msra.mxu0 %v1461_v0  ;;  %v1476_v5 = vld [vmem:[%s1857_s1 + $0xb0] sm:$0xff]  ;;  %v1475_v9 = vld [vmem:[%s1857_s1 + $0xa8] sm:$0xff]  ;;  %s1526_s10 = smul.u32 72, %s1863_s13 }
   0xd   : > { %v1469_v2 = vld [vmem:[%s1857_s1 + $0x78] sm:$0xff]  ;;  %833 = vmatpush.bf16.msra.mxu2 %v1477_v1  ;;  %v1468_v6 = vld [vmem:[%s1857_s1 + $0x70] sm:$0xff]  ;;  %v1467_v10 = vld [vmem:[%s1857_s1 + $0x68] sm:$0xff] }
   0xe   : > { %v1485_v3 = vld [vmem:[%s1857_s1 + $0xf8] sm:$0xff]  ;;  %819 = vmatpush.bf16.msra.mxu1 %v1469_v2  ;;  %v1484_v7 = vld [vmem:[%s1857_s1 + $0xf0] sm:$0xff]  ;;  %v1483_v11 = vld [vmem:[%s1857_s1 + $0xe8] sm:$0xff]  ;;  %s1677_s23 = scalar_lea.vmem %s1856_s0, %s1526_s10 }
   0xf   : > { %847 = vmatpush.bf16.msra.mxu3 %v1485_v3  ;;  %v1458_v12 = vld [vmem:[%s1857_s1 + $0x20] sm:$0xff]  ;;  %v1457_v16 = vld [vmem:[%s1857_s1 + $0x18] sm:$0xff]  ;;  %v1456_v20 = vld [vmem:[%s1857_s1 + $0x10] sm:$0xff] }
  0x10   : > { %806 = vmatpush.bf16.msra.mxu0 %v1460_v4  ;;  %v1474_v13 = vld [vmem:[%s1857_s1 + $0xa0] sm:$0xff]  ;;  %v1473_v17 = vld [vmem:[%s1857_s1 + $0x98] sm:$0xff]  ;;  %v1472_v21 = vld [vmem:[%s1857_s1 + $0x90] sm:$0xff] }
  0x11   : > { %834 = vmatpush.bf16.msra.mxu2 %v1476_v5  ;;  %v1466_v14 = vld [vmem:[%s1857_s1 + $0x60] sm:$0xff]  ;;  %v1465_v18 = vld [vmem:[%s1857_s1 + $0x58] sm:$0xff]  ;;  %v1464_v22 = vld [vmem:[%s1857_s1 + $0x50] sm:$0xff] }
  0x12   : > { %820 = vmatpush.bf16.msra.mxu1 %v1468_v6  ;;  %v1482_v15 = vld [vmem:[%s1857_s1 + $0xe0] sm:$0xff]  ;;  %v1481_v19 = vld [vmem:[%s1857_s1 + $0xd8] sm:$0xff]  ;;  %v1480_v23 = vld [vmem:[%s1857_s1 + $0xd0] sm:$0xff] }
  0x13   : > { %848 = vmatpush.bf16.msra.mxu3 %v1484_v7  ;;  %v1455_v24 = vld [vmem:[%s1857_s1 + $0x8] sm:$0xff]  ;;  %v1454_v28 = vld [vmem:[%s1857_s1] sm:$0xff]  ;;  %v1493_v30 = vld [vmem:[%s1857_s1 + $0x138] sm:$0xff] }
  0x14   : > { %807 = vmatpush.bf16.msra.mxu0 %v1459_v8  ;;  %v1471_v25 = vld [vmem:[%s1857_s1 + $0x88] sm:$0xff]  ;;  %v1470_v29 = vld [vmem:[%s1857_s1 + $0x80] sm:$0xff]  ;;  %v1509_v31 = vld [vmem:[%s1857_s1 + $0x1b8] sm:$0xff] }
  0x15   : > { %835 = vmatpush.bf16.msra.mxu2 %v1475_v9  ;;  %v1463_v26 = vld [vmem:[%s1857_s1 + $0x48] sm:$0xff]  ;;  %v1462_v32 = vld [vmem:[%s1857_s1 + $0x40] sm:$0xff]  ;;  %v1501_v38 = vld [vmem:[%s1857_s1 + $0x178] sm:$0xff] }
  0x16   : > { %821 = vmatpush.bf16.msra.mxu1 %v1467_v10  ;;  %v1479_v27 = vld [vmem:[%s1857_s1 + $0xc8] sm:$0xff]  ;;  %v1478_v33 = vld [vmem:[%s1857_s1 + $0xc0] sm:$0xff]  ;;  %v1517_v39 = vld [vmem:[%s1857_s1 + $0x1f8] sm:$0xff] }
  0x17   : > { %849 = vmatpush.bf16.msra.mxu3 %v1483_v11  ;;  %v1118_v34 = vld [vmem:[%s1677_s23] sm:$0xf]  ;;  %v1449_v35 = vld [vmem:[%s1677_s23 + $0x20] sm:$0xf0]  ;;  %v1126_v36 = vld [vmem:[%s1677_s23 + $0x8] sm:$0xf] }
  0x18   : > { %808 = vmatpush.bf16.msra.mxu0 %v1458_v12  ;;  %v1450_v37 = vld [vmem:[%s1677_s23 + $0x28] sm:$0xf0]  ;;  %v1445_v40 = vld [vmem:[%s1677_s23 + $0x4] sm:$0xf]  ;;  %v1120_v41 = vld [vmem:[%s1677_s23 + $0x24] sm:$0xf0]  ;;  %v1119_v44 = vor.u32 %v1449_v35, %v1118_v34 }
  0x19   : > { %836 = vmatpush.bf16.msra.mxu2 %v1474_v13  ;;  %v1446_v42 = vld [vmem:[%s1677_s23 + $0xc] sm:$0xf]  ;;  %v1128_v43 = vld [vmem:[%s1677_s23 + $0x2c] sm:$0xf0]  ;;  %v1127_v45 = vor.u32 %v1450_v37, %v1126_v36  ;;  %v1123_v48 = vor.u32 %v1445_v40, %v1120_v41  ;;  %v1490_v56 = vld [vmem:[%s1857_s1 + $0x120] sm:$0xff] }
  0x1a   : > { %822 = vmatpush.bf16.msra.mxu1 %v1466_v14  ;;  %v1492_v46 = vld [vmem:[%s1857_s1 + $0x130] sm:$0xff]  ;;  %v1131_v49 = vor.u32 %v1446_v42, %v1128_v43  ;;  %v1491_v52 = vld [vmem:[%s1857_s1 + $0x128] sm:$0xff]  ;;  %v1506_v57 = vld [vmem:[%s1857_s1 + $0x1a0] sm:$0xff] }
  0x1b   : > { %850 = vmatpush.bf16.msra.mxu3 %v1482_v15  ;;  %v1508_v47 = vld [vmem:[%s1857_s1 + $0x1b0] sm:$0xff]  ;;  %v1507_v53 = vld [vmem:[%s1857_s1 + $0x1a8] sm:$0xff]  ;;  %v1498_v58 = vld [vmem:[%s1857_s1 + $0x160] sm:$0xff] }
  0x1c   : > { %809 = vmatpush.bf16.msra.mxu0 %v1457_v16  ;;  %v1500_v50 = vld [vmem:[%s1857_s1 + $0x170] sm:$0xff]  ;;  %v1499_v54 = vld [vmem:[%s1857_s1 + $0x168] sm:$0xff]  ;;  %v1514_v59 = vld [vmem:[%s1857_s1 + $0x1e0] sm:$0xff] }
  0x1d   : > { %837 = vmatpush.bf16.msra.mxu2 %v1473_v17  ;;  %v1516_v51 = vld [vmem:[%s1857_s1 + $0x1f0] sm:$0xff]  ;;  %v1515_v55 = vld [vmem:[%s1857_s1 + $0x1e8] sm:$0xff]  ;;  %v1489_v60 = vld [vmem:[%s1857_s1 + $0x118] sm:$0xff] }
  0x1e   : > { %823 = vmatpush.bf16.msra.mxu1 %v1465_v18  ;;  %v1505_v61 = vld [vmem:[%s1857_s1 + $0x198] sm:$0xff]  ;;  %v1488_v0 = vld [vmem:[%s1857_s1 + $0x110] sm:$0xff]  ;;  %v1487_v4 = vld [vmem:[%s1857_s1 + $0x108] sm:$0xff] }
  0x1f   : > { %851 = vmatpush.bf16.msra.mxu3 %v1481_v19  ;;  %v1497_v62 = vld [vmem:[%s1857_s1 + $0x158] sm:$0xff]  ;;  %v1504_v1 = vld [vmem:[%s1857_s1 + $0x190] sm:$0xff]  ;;  %v1503_v5 = vld [vmem:[%s1857_s1 + $0x188] sm:$0xff] }
  0x20   : > { %810 = vmatpush.bf16.msra.mxu0 %v1456_v20  ;;  %v1513_v63 = vld [vmem:[%s1857_s1 + $0x1d8] sm:$0xff]  ;;  %v1496_v2 = vld [vmem:[%s1857_s1 + $0x150] sm:$0xff]  ;;  %v1495_v6 = vld [vmem:[%s1857_s1 + $0x148] sm:$0xff] }
  0x21   : > { %838 = vmatpush.bf16.msra.mxu2 %v1472_v21  ;;  %v1512_v3 = vld [vmem:[%s1857_s1 + $0x1d0] sm:$0xff]  ;;  %v1511_v7 = vld [vmem:[%s1857_s1 + $0x1c8] sm:$0xff]  ;;  %v1486_v8 = vld [vmem:[%s1857_s1 + $0x100] sm:$0xff] }
  0x22   : > { %824 = vmatpush.bf16.msra.mxu1 %v1464_v22  ;;  %v1502_v9 = vld [vmem:[%s1857_s1 + $0x180] sm:$0xff]  ;;  %v1525_v10 = vld [vmem:[%s1857_s1 + $0x238] sm:$0xff]  ;;  %v1134_v11 = vld [vmem:[%s1677_s23 + $0x10] sm:$0xf] }
  0x23   : > { %852 = vmatpush.bf16.msra.mxu3 %v1480_v23  ;;  %v1451_v12 = vld [vmem:[%s1677_s23 + $0x30] sm:$0xf0]  ;;  %v1142_v13 = vld [vmem:[%s1677_s23 + $0x18] sm:$0xf]  ;;  %v1452_v14 = vld [vmem:[%s1677_s23 + $0x38] sm:$0xf0] }
  0x24   : > { %811 = vmatpush.bf16.msra.mxu0 %v1455_v24  ;;  %v1494_v15 = vld [vmem:[%s1857_s1 + $0x140] sm:$0xff]  ;;  %v1447_v17 = vld [vmem:[%s1677_s23 + $0x14] sm:$0xf]  ;;  %v1136_v18 = vld [vmem:[%s1677_s23 + $0x34] sm:$0xf0]  ;;  %v1135_v21 = vor.u32 %v1451_v12, %v1134_v11  ;;  %v1143_v22 = vor.u32 %v1452_v14, %v1142_v13 }
  0x25   : > { %839 = vmatpush.bf16.msra.mxu2 %v1471_v25  ;;  %v1510_v16 = vld [vmem:[%s1857_s1 + $0x1c0] sm:$0xff]  ;;  %v1448_v19 = vld [vmem:[%s1677_s23 + $0x1c] sm:$0xf]  ;;  %v1139_v23 = vor.u32 %v1447_v17, %v1136_v18  ;;  %v1524_v25 = vld [vmem:[%s1857_s1 + $0x230] sm:$0xff] }
  0x26   : > { %825 = vmatpush.bf16.msra.mxu1 %v1463_v26  ;;  %v1144_v20 = vld [vmem:[%s1677_s23 + $0x3c] sm:$0xf0]  ;;  %v1523_v26 = vld [vmem:[%s1857_s1 + $0x228] sm:$0xff] }
  0x27   : > { %853 = vmatpush.bf16.msra.mxu3 %v1479_v27  ;;  %v1147_v24 = vor.u32 %v1448_v19, %v1144_v20  ;;  %v1522_v27 = vld [vmem:[%s1857_s1 + $0x220] sm:$0xff] }
  0x28   : > { %812 = vmatpush.bf16.msra.mxu0 %v1454_v28  ;;  %v1521_v28 = vld [vmem:[%s1857_s1 + $0x218] sm:$0xff] }
  0x29   : > { %840 = vmatpush.bf16.msra.mxu2 %v1470_v29  ;;  %v1520_v29 = vld [vmem:[%s1857_s1 + $0x210] sm:$0xff] }
  0x2a   : > { %826 = vmatpush.bf16.msra.mxu1 %v1462_v32  ;;  %v1150_v32 = vld [vmem:[%s1677_s23 + $0x20] sm:$0xf] }
  0x2b   : > { %854 = vmatpush.bf16.msra.mxu3 %v1478_v33  ;;  %813 = vmatmul.bf16.vlgmr.msra.gmra.mxu0 %v1119_v44  ;;  %v1453_v33 = vld [vmem:[%s1677_s23 + $0x40] sm:$0xf0]  ;;  %s1444_s23 = sshll.u32 %s1863_s13, 4 }
  0x2c   : > { %861 = vmatpush.bf16.msrb.mxu0 %v1493_v30  ;;  %841 = vmatmul.bf16.vlgmr.msra.gmra.mxu2 %v1127_v45  ;;  %v1519_v30 = vld [vmem:[%s1857_s1 + $0x208] sm:$0xff]  ;;  %v1151_v34 = vor.u32 %v1453_v33, %v1150_v32  ;;  %s170_s19 = scalar_lea.vmem %s1859_s3, %s1444_s23 }
  0x2d   : > { %889 = vmatpush.bf16.msrb.mxu2 %v1509_v31  ;;  %827 = vmatmul.bf16.vlgmr.msra.gmra.mxu1 %v1123_v48  ;;  %v1518_v31 = vld [vmem:[%s1857_s1 + $0x200] sm:$0xff] }
  0x2e   : > { %875 = vmatpush.bf16.msrb.mxu1 %v1501_v38  ;;  %855 = vmatmul.bf16.vlgmr.msra.gmra.mxu3 %v1131_v49  ;;  %v1832_v38 = vld [vmem:[%s1858_s2] sm:$0xff] }
  0x2f   : > { %903 = vmatpush.bf16.msrb.mxu3 %v1517_v39  ;;  %v326_v41 = vperm.slane %v1832_v38, 0 }
  0x30   : > { %862 = vmatpush.bf16.msrb.mxu0 %v1492_v46 }
  0x31   : > { %890 = vmatpush.bf16.msrb.mxu2 %v1508_v47 }
  0x32   : > { %876 = vmatpush.bf16.msrb.mxu1 %v1500_v50 }
  0x33   : > { %904 = vmatpush.bf16.msrb.mxu3 %v1516_v51 }
  0x34   : > { %863 = vmatpush.bf16.msrb.mxu0 %v1491_v52 }
  0x35   : > { %891 = vmatpush.bf16.msrb.mxu2 %v1507_v53 }
  0x36   : > { %877 = vmatpush.bf16.msrb.mxu1 %v1499_v54 }
  0x37   : > { %905 = vmatpush.bf16.msrb.mxu3 %v1515_v55 }
  0x38   : > { %864 = vmatpush.bf16.msrb.mxu0 %v1490_v56 }
  0x39   : > { %892 = vmatpush.bf16.msrb.mxu2 %v1506_v57 }
  0x3a   : > { %878 = vmatpush.bf16.msrb.mxu1 %v1498_v58 }
  0x3b   : > { %906 = vmatpush.bf16.msrb.mxu3 %v1514_v59 }
  0x3c   : > { %865 = vmatpush.bf16.msrb.mxu0 %v1489_v60 }
  0x3d   : > { %893 = vmatpush.bf16.msrb.mxu2 %v1505_v61 }
  0x3e   : > { %879 = vmatpush.bf16.msrb.mxu1 %v1497_v62 }
  0x3f   : > { %907 = vmatpush.bf16.msrb.mxu3 %v1513_v63 }
  0x40   : > { %866 = vmatpush.bf16.msrb.mxu0 %v1488_v0 }
  0x41   : > { %894 = vmatpush.bf16.msrb.mxu2 %v1504_v1 }
  0x42   : > { %880 = vmatpush.bf16.msrb.mxu1 %v1496_v2 }
  0x43   : > { %908 = vmatpush.bf16.msrb.mxu3 %v1512_v3 }
  0x44   : > { %867 = vmatpush.bf16.msrb.mxu0 %v1487_v4 }
  0x45   : > { %895 = vmatpush.bf16.msrb.mxu2 %v1503_v5 }
  0x46   : > { %881 = vmatpush.bf16.msrb.mxu1 %v1495_v6 }
  0x47   : > { %909 = vmatpush.bf16.msrb.mxu3 %v1511_v7 }
  0x48   : > { %868 = vmatpush.bf16.msrb.mxu0 %v1486_v8 }
  0x49   : > { %896 = vmatpush.bf16.msrb.mxu2 %v1502_v9  ;;  %v931_v9 = vlaneseq }
  0x4a   : > { %882 = vmatpush.bf16.msrb.mxu1 %v1494_v15 }
  0x4b   : > { %910 = vmatpush.bf16.msrb.mxu3 %v1510_v16  ;;  %869 = vmatmul.bf16.vlgmr.msrb.gmra.mxu0 %v1135_v21  ;;  %v932_v12 = vand.u32 127, %v931_v9 }
  0x4c   : > { %917 = vmatpush.bf16.msra.mxu0 %v1525_v10  ;;  %897 = vmatmul.bf16.vlgmr.msrb.gmra.mxu2 %v1143_v22 }
  0x4d   : > { %883 = vmatmul.bf16.vlgmr.msrb.gmra.mxu1 %v1139_v23  ;;  %v937_v15 = vand.u32 31, %v932_v12 }
  0x4e   : > { %911 = vmatmul.bf16.vlgmr.msrb.gmra.mxu3 %v1147_v24 }
  0x4f   : > { %vm1835_vm0 = vcmp.lt.s32.totalorder %v937_v15, 16 }
  0x50   : > { %918 = vmatpush.bf16.msra.mxu0 %v1524_v25 }
  0x54   : > { %919 = vmatpush.bf16.msra.mxu0 %v1523_v26 }
  0x58   : > { %920 = vmatpush.bf16.msra.mxu0 %v1522_v27 }
  0x5c   : > { %921 = vmatpush.bf16.msra.mxu0 %v1521_v28 }
  0x60   : > { %922 = vmatpush.bf16.msra.mxu0 %v1520_v29 }
  0x64   : > { %923 = vmatpush.bf16.msra.mxu0 %v1519_v30 }
  0x68   : > { %924 = vmatpush.bf16.msra.mxu0 %v1518_v31 }
  0x6b   : > { %925 = vmatmul.bf16.vlgmr.msra.gmra.mxu0 %v1151_v34 }
  0xa8   : > { %v814_v35 = vpop.f32.mrf.mxu0 }
  0xa9   : > { %v815_v43 = vadd.f32 %v814_v35, %v326_v41 }
  0xaa   : > { %v828_v36 = vpop.f32.mrf.mxu1 }
  0xab   : > { %v829_v46 = vadd.f32 %v828_v36, %v815_v43 }
  0xaf   : > { %v842_v37 = vpop.f32.mrf.mxu2 }
  0xb0   : > { %v816_v39 = vpop.f32.mrf.mxu0  ;;  %v843_v49 = vadd.f32 %v842_v37, %v829_v46 }
  0xb1   : > { %v856_v40 = vpop.f32.mrf.mxu3  ;;  %v817_v47 = vadd.f32 %v816_v39, %v326_v41 }
  0xb2   : > { %v830_v42 = vpop.f32.mrf.mxu1  ;;  %v857_v53 = vadd.f32 %v856_v40, %v843_v49 }
  0xb3   : > { %v831_v50 = vadd.f32 %v830_v42, %v817_v47 }
  0xb7   : > { %v844_v44 = vpop.f32.mrf.mxu2 }
  0xb8   : > { %v845_v54 = vadd.f32 %v844_v44, %v831_v50 }
  0xb9   : > { %v858_v48 = vpop.f32.mrf.mxu3 }
  0xba   : > { %v859_v57 = vadd.f32 %v858_v48, %v845_v54 }
  0xc8   : > { %v870_v45 = vpop.f32.mrf.mxu0 }
  0xc9   : > { %v871_v58 = vadd.f32 %v870_v45, %v857_v53 }
  0xca   : > { %v884_v51 = vpop.f32.mrf.mxu1 }
  0xcb   : > { %v885_v61 = vadd.f32 %v884_v51, %v871_v58 }
  0xcf   : > { %v898_v52 = vpop.f32.mrf.mxu2 }
  0xd0   : > { %v872_v55 = vpop.f32.mrf.mxu0  ;;  %v899_v1 = vadd.f32 %v898_v52, %v885_v61 }
  0xd1   : > { %v912_v56 = vpop.f32.mrf.mxu3  ;;  %v873_v59 = vadd.f32 %v872_v55, %v859_v57 }
  0xd2   : > { %v886_v60 = vpop.f32.mrf.mxu1  ;;  %v913_v4 = vadd.f32 %v912_v56, %v899_v1 }
  0xd3   : > { %v887_v0 = vadd.f32 %v886_v60, %v873_v59 }
  0xd7   : > { %v900_v62 = vpop.f32.mrf.mxu2 }
  0xd8   : > { %v901_v2 = vadd.f32 %v900_v62, %v887_v0 }
  0xd9   : > { %v914_v3 = vpop.f32.mrf.mxu3 }
  0xda   : > { %v915_v5 = vadd.f32 %v914_v3, %v901_v2 }
  0xe8   : > { %v926_v63 = vpop.f32.mrf.mxu0 }
  0xe9   : > { %v927_v7 = vadd.f32 %v926_v63, %v913_v4  ;;  %v1008_v63 = vperm.slane %v1832_v38, 2 }
  0xf0   : > { %v928_v6 = vpop.f32.mrf.mxu0 }
  0xf1   : > { %v929_v8 = vadd.f32 %v928_v6, %v915_v5 }
  0xf3   : > { %v946_v10 = vadd.f32 %v929_v8, %v927_v7 }
  0xf5   : > { %v947_v11 = vrot.slane %v946_v10, 4 }
  0xf7   : > { %v948_v13 = vadd.f32 %v947_v11, %v946_v10 }
  0xf9   : > { %v949_v14 = vrot.slane %v948_v13, 2 }
  0xfb   : > { %v950_v16 = vadd.f32 %v949_v14, %v948_v13 }
  0xfd   : > { %v951_v17 = vrot.slane %v950_v16, 1 }
  0xff   : > { %v952_v19 = vadd.f32 %v951_v17, %v950_v16 }
 0x101   : > { %v953_v20 = vsel %vm1835_vm0, %v952_v19, 0.0 }
 0x102   : > { %954 = vadd.xlane.f32.xlu0 %v953_v20 }
 0x10a   : > { %956 = vadd.xlane.f32.xlu0 %v952_v19 }
 0x175   : > { %v955_v21 = vpop.xlane.xlu0 %954 }
 0x176   : > { %v959_v24 = vmul.f32 0.0009765625, %v955_v21 }
 0x17d   : > { %v957_v22 = vpop.xlane.xlu0 %956 }
 0x17e   : > { %v958_v23 = vsub.f32 %v957_v22, %v955_v21 }
 0x180   : > { %v960_v25 = vmul.f32 0.0009765625, %v958_v23 }
 0x182   : > { %v961_v26 = vsel %vm1835_vm0, %v959_v24, %v960_v25 }
 0x183   : > { %v962_v27 = vsub.f32 %v927_v7, %v961_v26  ;;  %v963_v28 = vsub.f32 %v929_v8, %v961_v26 }
 0x185   : > { %v964_v29 = vmul.f32 %v962_v27, %v962_v27  ;;  %v965_v30 = vmul.f32 %v963_v28, %v963_v28 }
 0x187   : > { %v966_v31 = vadd.f32 %v965_v30, %v964_v29 }
 0x189   : > { %v967_v32 = vrot.slane %v966_v31, 4 }
 0x18b   : > { %v968_v33 = vadd.f32 %v967_v32, %v966_v31 }
 0x18d   : > { %v969_v34 = vrot.slane %v968_v33, 2 }
 0x18f   : > { %v970_v35 = vadd.f32 %v969_v34, %v968_v33 }
 0x191   : > { %v971_v36 = vrot.slane %v970_v35, 1 }
 0x193   : > { %v972_v37 = vadd.f32 %v971_v36, %v970_v35 }
 0x195   : > { %v973_v39 = vsel %vm1835_vm0, %v972_v37, 0.0 }
 0x196   : > { %974 = vadd.xlane.f32.xlu1 %v973_v39 }
 0x19e   : > { %976 = vadd.xlane.f32.xlu1 %v972_v37 }
 0x209   : > { %v975_v40 = vpop.xlane.xlu1 %974 }
 0x20a   : > { %v979_v41 = vmul.f32 0.0009765625, %v975_v40 }
 0x20c   : > { %v980_v42 = vadd.f32 1e-05, %v979_v41 }
 0x20e   : > { %1535 = vrsqrt.f32 %v980_v42  ;;  %vm987_vm3 = vweird.f32 %v980_v42 }
 0x211   : > { %v977_v43 = vpop.xlane.xlu1 %976 }
 0x212   : > { %v978_v44 = vsub.f32 %v977_v43, %v975_v40 }
 0x214   : > { %v1536_v45 = vpop.eup %1535  ;;  %v991_v46 = vmul.f32 0.0009765625, %v978_v44 }
 0x215   : > { %v982_v47 = vmul.f32 %v1536_v45, %v980_v42  ;;  %vm988_vm1 = vweird.f32 %v1536_v45 }
 0x216   : > { %v992_v48 = vadd.f32 1e-05, %v991_v46  ;;  %vm989_vm4 = vmor %vm987_vm3, %vm988_vm1 }
 0x217   : > { %v983_v49 = vmul.f32 %v1536_v45, %v982_v47 }
 0x218   : > { %1537 = vrsqrt.f32 %v992_v48  ;;  %vm999_vm5 = vweird.f32 %v992_v48 }
 0x219   : > { %v984_v50 = vmul.f32 0.5, %v983_v49 }
 0x21b   : > { %v985_v53 = vsub.f32 1.5, %v984_v50 }
 0x21d   : > { %v986_v56 = vmul.f32 %v1536_v45, %v985_v53 }
 0x21e   : > { %v1538_v51 = vpop.eup %1537 }
 0x21f   : > { %v994_v52 = vmul.f32 %v1538_v51, %v992_v48  ;;  %vm1000_vm2 = vweird.f32 %v1538_v51  ;;  %v990_v59 = vsel %vm989_vm4, %v1536_v45, %v986_v56 }
 0x220   : > { %vm1001_vm6 = vmor %vm999_vm5, %vm1000_vm2 }
 0x221   : > { %v995_v54 = vmul.f32 %v1538_v51, %v994_v52 }
 0x223   : > { %v996_v55 = vmul.f32 0.5, %v995_v54 }
 0x225   : > { %v997_v57 = vsub.f32 1.5, %v996_v55 }
 0x227   : > { %v998_v58 = vmul.f32 %v1538_v51, %v997_v57 }
 0x229   : > { %v1002_v60 = vsel %vm1001_vm6, %v1538_v51, %v998_v58 }
 0x22a   : > { %v1003_v61 = vsel %vm1835_vm0, %v990_v59, %v1002_v60 }
 0x22b   : > { %v1004_v62 = vmul.f32 %v1003_v61, %v1832_v38 }
 0x22d   : > { %v1005_v0 = vperm.slane %v1004_v62, 1 }
 0x22f   : > { %v1006_v1 = vmul.f32 %v1005_v0, %v962_v27  ;;  %v1007_v2 = vmul.f32 %v1005_v0, %v963_v28 }
 0x231   : > { %v1009_v3 = vadd.f32 %v1008_v63, %v1006_v1  ;;  %v1010_v4 = vadd.f32 %v1008_v63, %v1007_v2 }
 0x233   : > { %v1440_v5 = vmul.f32 -1.442695, %v1009_v3  ;;  %v1441_v6 = vmul.f32 -1.442695, %v1010_v4 }
 0x235   : > { %1539 = vpow2.f32 %v1440_v5 }
 0x236   : > { %1541 = vpow2.f32 %v1441_v6 }
 0x23b   : > { %v1540_v7 = vpop.eup %1539 }
 0x23c   : > { %v1542_v8 = vpop.eup %1541  ;;  %v1017_v9 = vadd.f32 1.0, %v1540_v7 }
 0x23d   : > { %v1018_v10 = vadd.f32 1.0, %v1542_v8 }
 0x23e   : > { %1543 = vrcp.f32 %v1017_v9  ;;  %v1030_v15 = vand.u32 2147483648, %v1017_v9  ;;  %v1028_v18 = vand.u32 2147483647, %v1017_v9  ;;  %vm1024_vm9 = vweird.f32 %v1017_v9 }
 0x23f   : > { %1545 = vrcp.f32 %v1018_v10  ;;  %v1045_v19 = vand.u32 2147483648, %v1018_v10  ;;  %v1043_v21 = vand.u32 2147483647, %v1018_v10  ;;  %vm1039_vm11 = vweird.f32 %v1018_v10 }
 0x240   : > { %v1031_v23 = vor.u32 1.1754944e-38, %v1030_v15  ;;  %vm1029_vm12 = vcmp.eq.f32.partialorder %v1028_v18, 8.507059e+37 }
 0x241   : > { %v1046_v26 = vor.u32 1.1754944e-38, %v1045_v19  ;;  %vm1044_vm14 = vcmp.eq.f32.partialorder %v1043_v21, 8.507059e+37 }
 0x244   : > { %v1544_v11 = vpop.eup %1543 }
 0x245   : > { %v1546_v12 = vpop.eup %1545  ;;  %v1020_v13 = vmul.f32 %v1544_v11, %v1017_v9  ;;  %vm1025_vm7 = vweird.f32 %v1544_v11 }
 0x246   : > { %v1035_v38 = vmul.f32 %v1546_v12, %v1018_v10  ;;  %vm1040_vm8 = vweird.f32 %v1546_v12  ;;  %vm1026_vm10 = vmor %vm1024_vm9, %vm1025_vm7 }
 0x247   : > { %v1021_v14 = vsub.f32 1.0, %v1020_v13  ;;  %vm1041_vm13 = vmor %vm1039_vm11, %vm1040_vm8 }
 0x248   : > { %v1036_v16 = vsub.f32 1.0, %v1035_v38 }
 0x249   : > { %v1022_v17 = vmul.f32 %v1544_v11, %v1021_v14 }
 0x24a   : > { %v1037_v20 = vmul.f32 %v1546_v12, %v1036_v16 }
 0x24b   : > { %v1023_v22 = vadd.f32 %v1544_v11, %v1022_v17 }
 0x24c   : > { %v1038_v24 = vadd.f32 %v1546_v12, %v1037_v20 }
 0x24d   : > { %v1027_v25 = vsel %vm1026_vm10, %v1544_v11, %v1023_v22 }
 0x24e   : > { %v1032_v27 = vsel %vm1029_vm12, %v1031_v23, %v1027_v25  ;;  %v1042_v28 = vsel %vm1041_vm13, %v1546_v12, %v1038_v24 }
 0x24f   : > { %v1047_v29 = vsel %vm1044_vm14, %v1046_v26, %v1042_v28  ;;  %v1049_v30 = vmul.f32 %v1032_v27, %v1009_v3 }
 0x250   : > { %v1050_v31 = vmul.f32 %v1047_v29, %v1010_v4 }
 0x251   : > { %1051 = vst [vmem:[%s170_s19] sm:$0xff] %v1049_v30 }
 0x252   : > { %1052 = vst [vmem:[%s170_s19 + $0x8] sm:$0xff] %v1050_v31 }
 0x253 PF: > { %s13_s12 = sadd.s32 1, %s1553_s12  }
 0x254   : > { %p10_p4 = scmp.ge.s32.totalorder %s13_s12, 4  }
 0x256   :  { %12 = sbr.rel (!%p10_p4) target bundleno = 1 (0x1), region = 62 }

</bundles_post_ra>
